<compile_context>
chip_gen: v5e
topology: v5e:2x2
jax: 0.10.0
libtpu: 0.0.40
codegen_flags: <defaults>
</compile_context>

<pallas_src>
import math

import jax
import jax.numpy as jnp
import numpy as np
from jax.experimental import pallas as pl
from jax.experimental.pallas import tpu as pltpu

# ----------------------------- model config ---------------------------------
NTOKEN = 200
D_MODEL = 32
NHEAD = 2                 # module-level `nhead = 2`
D_HID = 32
NLAYERS = 2
HEAD_DIM = D_MODEL // NHEAD
EPS = 1e-5
NTOKEN_PAD = ((NTOKEN + 127) // 128) * 128   # 256 -> lane-dense output stores

# ------------------------------ input shapes --------------------------------
SEQ = 8
BATCH = 2


# ------------------------------- Pallas kernel ------------------------------
def _layer_norm(x, g, b):
    mu = jnp.mean(x, axis=-1, keepdims=True)
    var = jnp.mean(jnp.square(x - mu), axis=-1, keepdims=True)
    return (x - mu) * jax.lax.rsqrt(var + EPS) * g + b


def fused_forward_kernel(x_ref, mask_ref,
                         wqkv_ref, bqkv_ref, wo_ref, bo_ref,
                         g1_ref, b1_ref, w1_ref, bf1_ref,
                         w2_ref, bf2_ref, g2_ref, b2_ref,
                         lin_w_ref, lin_b_ref,
                         o_ref):
    """Entire forward (NLAYERS post-norm encoder layers + final linear) for one
    batch element (grid = (B,))."""
    x = x_ref[0]                       # (S, D)
    mask_b = mask_ref[...][None]       # (1, S, S) causal mask (0 / -inf), hoisted
    S = x.shape[0]

    for l in range(NLAYERS):           # static unroll over layers
        # ---- fused, head-batched QKV projection: one batched dot -> (3H, S, K)
        # Q-head weights/biases already carry the 1/sqrt(head_dim) scale.
        w_qkv = wqkv_ref[l]            # (3H, D, K)   [q heads | k heads | v heads]
        b_qkv = bqkv_ref[l]            # (3H, 1, K)
        xh = jnp.broadcast_to(x[None], (3 * NHEAD, S, D_MODEL))
        qkv = jax.lax.dot_general(xh, w_qkv, (((2,), (1,)), ((0,), (0,))),
                                  preferred_element_type=jnp.float32) + b_qkv
        q = qkv[:NHEAD]                # leading-dim slices only (no lane slicing)
        k = qkv[NHEAD:2 * NHEAD]
        v = qkv[2 * NHEAD:]

        # ---- attention with head as the leading batch dim
        s = jax.lax.dot_general(q, k, (((2,), (2,)), ((0,), (0,))),
                                preferred_element_type=jnp.float32)    # (H, S, S)
        s = s + mask_b
        s = s - jnp.max(s, axis=-1, keepdims=True)
        p = jnp.exp(s)
        p = p * pl.reciprocal(jnp.sum(p, axis=-1, keepdims=True), approx=True)
        ctx = jax.lax.dot_general(p, v, (((2,), (1,)), ((0,), (0,))),
                                  preferred_element_type=jnp.float32)  # (H, S, K)

        # output projection: sum_h ctx_h @ Wo_h  (no in-kernel concat)
        attn_h = jax.lax.dot_general(ctx, wo_ref[l], (((2,), (1,)), ((0,), (0,))),
                                     preferred_element_type=jnp.float32)  # (H, S, D)
        attn = jnp.sum(attn_h, axis=0) + bo_ref[l]

        y = _layer_norm(x + attn, g1_ref[l], b1_ref[l])       # norm1(residual)

        # ---- feed-forward (ReLU), dropout = eval identity
        h1 = jnp.maximum(
            jnp.dot(y, w1_ref[l], preferred_element_type=jnp.float32) + bf1_ref[l],
            0.0)
        ff = jnp.dot(h1, w2_ref[l], preferred_element_type=jnp.float32) + bf2_ref[l]
        x = _layer_norm(y + ff, g2_ref[l], b2_ref[l])         # norm2(residual)

    # ---- final linear, lane-dense padded output (NTOKEN -> NTOKEN_PAD)
    logits = (jnp.dot(x, lin_w_ref[...], preferred_element_type=jnp.float32)
              + lin_b_ref[...])
    o_ref[0] = logits


# ------------------------------ Pallas wrapper -------------------------------
def fused_forward_pallas(x, mask, P):
    B, S, D = x.shape
    consts = [mask, P["wqkv"], P["bqkv"], P["wo"], P["bo"],
              P["g1"], P["b1"], P["w1"], P["bf1"],
              P["w2"], P["bf2"], P["g2"], P["b2"],
              P["lin_w"], P["lin_b"]]
    # Constant block index across the grid -> weights stay resident in VMEM
    # (no re-DMA between the two grid steps).
    const_specs = [pl.BlockSpec(c.shape, lambda b, _n=c.ndim: (0,) * _n)
                   for c in consts]
    return pl.pallas_call(
        fused_forward_kernel,
        out_shape=jax.ShapeDtypeStruct((B, S, NTOKEN_PAD), jnp.float32),
        grid=(B,),
        in_specs=[pl.BlockSpec((1, S, D), lambda b: (b, 0, 0))] + const_specs,
        out_specs=pl.BlockSpec((1, S, NTOKEN_PAD), lambda b: (b, 0, 0)),
        compiler_params=pltpu.CompilerParams(dimension_semantics=("parallel",)),
    )(x, *consts)


# ------------------------------ glue (plain JAX) -----------------------------
def positional_encoding(seq_len, d_model):
    position = jnp.arange(seq_len, dtype=jnp.float32)[:, None]
    div_term = jnp.exp(jnp.arange(0, d_model, 2, dtype=jnp.float32)
                       * (-math.log(10000.0) / d_model))
    pe = jnp.zeros((seq_len, 1, d_model), jnp.float32)
    pe = pe.at[:, 0, 0::2].set(jnp.sin(position * div_term))
    pe = pe.at[:, 0, 1::2].set(jnp.cos(position * div_term))
    return pe


def causal_mask(seq_len):
    i = jnp.arange(seq_len)
    return jnp.where(i[None, :] > i[:, None], -jnp.inf, 0.0).astype(jnp.float32)


def init_params(key):
    """Raw PyTorch-layout parameters (as nn.TransformerEncoderLayer stores them)."""
    def uni(k, shape, scale=0.1):
        return jax.random.uniform(k, shape, jnp.float32, -scale, scale)

    keys = jax.random.split(key, 2 + NLAYERS)
    params = {
        "emb": uni(keys[0], (NTOKEN, D_MODEL)),          # embedding.weight U(-0.1,0.1)
        "lin_w": uni(keys[1], (NTOKEN, D_MODEL)),        # linear.weight U(-0.1,0.1)
        "lin_b": jnp.zeros((NTOKEN,), jnp.float32),      # linear.bias = 0
        "layers": [],
    }
    for l in range(NLAYERS):
        k = jax.random.split(keys[2 + l], 8)
        params["layers"].append(dict(
            in_proj_w=uni(k[0], (3 * D_MODEL, D_MODEL)),
            in_proj_b=uni(k[1], (3 * D_MODEL,), 0.05),
            out_proj_w=uni(k[2], (D_MODEL, D_MODEL)),
            out_proj_b=uni(k[3], (D_MODEL,), 0.05),
            lin1_w=uni(k[4], (D_HID, D_MODEL)),
            lin1_b=uni(k[5], (D_HID,), 0.05),
            lin2_w=uni(k[6], (D_MODEL, D_HID)),
            lin2_b=uni(k[7], (D_MODEL,), 0.05),
            ln1_g=jnp.ones((D_MODEL,), jnp.float32),
            ln1_b=jnp.zeros((D_MODEL,), jnp.float32),
            ln2_g=jnp.ones((D_MODEL,), jnp.float32),
            ln2_b=jnp.zeros((D_MODEL,), jnp.float32),
        ))
    return params


def pack_params(params):
    """Repack raw params into the layer-stacked, head-batched kernel layout.

    The attention scale 1/sqrt(head_dim) is folded into the Q-head weights and
    biases so the kernel never multiplies the (H, S, S) score tile.
    """
    scale = 1.0 / math.sqrt(HEAD_DIM)
    wqkv, bqkv, wo, bo = [], [], [], []
    g1, b1, w1, bf1, w2, bf2, g2, b2 = ([] for _ in range(8))
    for lp in params["layers"]:
        in_w, in_b = lp["in_proj_w"], lp["in_proj_b"]
        w_heads, b_heads = [], []
        for m in range(3):                          # q, k, v blocks of in_proj
            blk_scale = scale if m == 0 else 1.0    # fold softmax scale into Q
            for h in range(NHEAD):
                rows = slice(m * D_MODEL + h * HEAD_DIM,
                             m * D_MODEL + (h + 1) * HEAD_DIM)
                w_heads.append(in_w[rows, :].T * blk_scale)      # (D, K)
                b_heads.append(in_b[rows][None, :] * blk_scale)  # (1, K)
        wqkv.append(jnp.stack(w_heads))             # (3H, D, K)
        bqkv.append(jnp.stack(b_heads))             # (3H, 1, K)
        ow = lp["out_proj_w"]                       # attn = ctx_cat @ ow.T + ob
        wo.append(jnp.stack([ow[:, h * HEAD_DIM:(h + 1) * HEAD_DIM].T
                             for h in range(NHEAD)]))   # (H, K, D)
        bo.append(lp["out_proj_b"][None, :])
        g1.append(lp["ln1_g"][None, :]); b1.append(lp["ln1_b"][None, :])
        w1.append(lp["lin1_w"].T);       bf1.append(lp["lin1_b"][None, :])
        w2.append(lp["lin2_w"].T);       bf2.append(lp["lin2_b"][None, :])
        g2.append(lp["ln2_g"][None, :]); b2.append(lp["ln2_b"][None, :])

    lin_w_pad = jnp.zeros((D_MODEL, NTOKEN_PAD), jnp.float32)
    lin_w_pad = lin_w_pad.at[:, :NTOKEN].set(params["lin_w"].T)
    lin_b_pad = jnp.zeros((1, NTOKEN_PAD), jnp.float32)
    lin_b_pad = lin_b_pad.at[:, :NTOKEN].set(params["lin_b"][None, :])

    return dict(
        wqkv=jnp.stack(wqkv), bqkv=jnp.stack(bqkv), wo=jnp.stack(wo), bo=jnp.stack(bo),
        g1=jnp.stack(g1), b1=jnp.stack(b1), w1=jnp.stack(w1), bf1=jnp.stack(bf1),
        w2=jnp.stack(w2), bf2=jnp.stack(bf2), g2=jnp.stack(g2), b2=jnp.stack(b2),
        lin_w=lin_w_pad, lin_b=lin_b_pad,
    )


@jax.jit
def transformer_forward(src, emb, packed):
    """src: int32 [seq_len, batch] -> float32 [seq_len, batch, ntoken]."""
    S, B = src.shape
    # TODO(synk): embedding gather + PE add stay as XLA glue; could be moved
    # in-kernel with PrefetchScalarGridSpec (src ids in SMEM) but is already tiny.
    x = emb[src] * math.sqrt(D_MODEL) + positional_encoding(S, D_MODEL)  # [S,B,D]
    x = jnp.transpose(x, (1, 0, 2))                                      # [B,S,D]
    out = fused_forward_pallas(x, causal_mask(S), packed)                # [B,S,256]
    return out[:, :, :NTOKEN].transpose(1, 0, 2)                         # [S,B,200]


# ------------------------------ plain-JAX reference --------------------------
def reference_forward(src, params):
    S, B = src.shape
    x = params["emb"][src] * math.sqrt(D_MODEL) + positional_encoding(S, D_MODEL)
    mask = causal_mask(S)
    x = jnp.transpose(x, (1, 0, 2))      # [B, S, D]
    for lp in params["layers"]:
        in_w, in_b = lp["in_proj_w"], lp["in_proj_b"]
        q = x @ in_w[:D_MODEL].T + in_b[:D_MODEL]
        k = x @ in_w[D_MODEL:2 * D_MODEL].T + in_b[D_MODEL:2 * D_MODEL]
        v = x @ in_w[2 * D_MODEL:].T + in_b[2 * D_MODEL:]
        qh = q.reshape(B, S, NHEAD, HEAD_DIM)
        kh = k.reshape(B, S, NHEAD, HEAD_DIM)
        vh = v.reshape(B, S, NHEAD, HEAD_DIM)
        s = jnp.einsum("bqhd,bkhd->bhqk", qh, kh) / math.sqrt(HEAD_DIM) + mask
        p = jax.nn.softmax(s, axis=-1)
        ctx = jnp.einsum("bhqk,bkhd->bqhd", p, vh).reshape(B, S, D_MODEL)
        attn = ctx @ lp["out_proj_w"].T + lp["out_proj_b"]
        y = _layer_norm(x + attn, lp["ln1_g"], lp["ln1_b"])
        ff = (jnp.maximum(y @ lp["lin1_w"].T + lp["lin1_b"], 0.0)
              @ lp["lin2_w"].T + lp["lin2_b"])
        x = _layer_norm(y + ff, lp["ln2_g"], lp["ln2_b"])
    out = x @ params["lin_w"].T + params["lin_b"]
    return jnp.transpose(out, (1, 0, 2))


# ----------------------------------- main ------------------------------------
if __name__ == "__main__":
    key = jax.random.PRNGKey(0)
    pkey, dkey = jax.random.split(key)
    params = init_params(pkey)
    packed = pack_params(params)
    src = jax.random.randint(dkey, (SEQ, BATCH), 0, NTOKEN, dtype=jnp.int32)

    out = jax.block_until_ready(transformer_forward(src, params["emb"], packed))
    ref = jax.block_until_ready(reference_forward(src, params))

    assert out.shape == (SEQ, BATCH, NTOKEN), out.shape
    assert out.dtype == jnp.float32
    # Default (native MXU) matmul precision in both paths -> modest tolerance.
    np.testing.assert_allclose(np.asarray(out), np.asarray(ref), atol=1e-2, rtol=1e-2)
    print("KERNEL_OK")
</pallas_src>

<mosaic_0001>
module attributes {stable_mosaic.version = 11 : i64} {
  func.func @fused_forward_kernel(%arg0: i32, %arg1: memref<1x8x32xf32, #tpu.memory_space<vmem>>, %arg2: memref<8x8xf32, #tpu.memory_space<vmem>>, %arg3: memref<2x6x32x16xf32, #tpu.memory_space<vmem>>, %arg4: memref<2x6x1x16xf32, #tpu.memory_space<vmem>>, %arg5: memref<2x2x16x32xf32, #tpu.memory_space<vmem>>, %arg6: memref<2x1x32xf32, #tpu.memory_space<vmem>>, %arg7: memref<2x1x32xf32, #tpu.memory_space<vmem>>, %arg8: memref<2x1x32xf32, #tpu.memory_space<vmem>>, %arg9: memref<2x32x32xf32, #tpu.memory_space<vmem>>, %arg10: memref<2x1x32xf32, #tpu.memory_space<vmem>>, %arg11: memref<2x32x32xf32, #tpu.memory_space<vmem>>, %arg12: memref<2x1x32xf32, #tpu.memory_space<vmem>>, %arg13: memref<2x1x32xf32, #tpu.memory_space<vmem>>, %arg14: memref<2x1x32xf32, #tpu.memory_space<vmem>>, %arg15: memref<32x256xf32, #tpu.memory_space<vmem>>, %arg16: memref<1x256xf32, #tpu.memory_space<vmem>>, %arg17: memref<1x8x256xf32, #tpu.memory_space<vmem>>) attributes {dimension_semantics = [#tpu.dimension_semantics<parallel>], iteration_bounds = array<i64: 2>, scalar_prefetch = 0 : i64, scratch_operands = 0 : i64, tpu.core_type = #tpu.core_type<tc>, window_params = [{transform_indices = @transform_0, window_bounds = array<i64: 1, 8, 32>}, {pipeline_mode = #tpu.pipeline_mode<synchronous>, transform_indices = @transform_1, window_bounds = array<i64: 8, 8>}, {pipeline_mode = #tpu.pipeline_mode<synchronous>, transform_indices = @transform_2, window_bounds = array<i64: 2, 6, 32, 16>}, {pipeline_mode = #tpu.pipeline_mode<synchronous>, transform_indices = @transform_3, window_bounds = array<i64: 2, 6, 1, 16>}, {pipeline_mode = #tpu.pipeline_mode<synchronous>, transform_indices = @transform_4, window_bounds = array<i64: 2, 2, 16, 32>}, {pipeline_mode = #tpu.pipeline_mode<synchronous>, transform_indices = @transform_5, window_bounds = array<i64: 2, 1, 32>}, {pipeline_mode = #tpu.pipeline_mode<synchronous>, transform_indices = @transform_6, window_bounds = array<i64: 2, 1, 32>}, {pipeline_mode = #tpu.pipeline_mode<synchronous>, transform_indices = @transform_7, window_bounds = array<i64: 2, 1, 32>}, {pipeline_mode = #tpu.pipeline_mode<synchronous>, transform_indices = @transform_8, window_bounds = array<i64: 2, 32, 32>}, {pipeline_mode = #tpu.pipeline_mode<synchronous>, transform_indices = @transform_9, window_bounds = array<i64: 2, 1, 32>}, {pipeline_mode = #tpu.pipeline_mode<synchronous>, transform_indices = @transform_10, window_bounds = array<i64: 2, 32, 32>}, {pipeline_mode = #tpu.pipeline_mode<synchronous>, transform_indices = @transform_11, window_bounds = array<i64: 2, 1, 32>}, {pipeline_mode = #tpu.pipeline_mode<synchronous>, transform_indices = @transform_12, window_bounds = array<i64: 2, 1, 32>}, {pipeline_mode = #tpu.pipeline_mode<synchronous>, transform_indices = @transform_13, window_bounds = array<i64: 2, 1, 32>}, {pipeline_mode = #tpu.pipeline_mode<synchronous>, transform_indices = @transform_14, window_bounds = array<i64: 32, 256>}, {pipeline_mode = #tpu.pipeline_mode<synchronous>, transform_indices = @transform_15, window_bounds = array<i64: 1, 256>}, {transform_indices = @transform_16, window_bounds = array<i64: 1, 8, 256>}]} {
    %c0 = arith.constant 0 : index
    %c0_0 = arith.constant 0 : index
    %c0_1 = arith.constant 0 : index
    %0 = vector.load %arg1[%c0, %c0_0, %c0_1] : memref<1x8x32xf32, #tpu.memory_space<vmem>>, vector<1x8x32xf32>
    %1 = vector.shape_cast %0 : vector<1x8x32xf32> to vector<8x32xf32>
    %c0_2 = arith.constant 0 : index
    %c0_3 = arith.constant 0 : index
    %2 = vector.load %arg2[%c0_2, %c0_3] : memref<8x8xf32, #tpu.memory_space<vmem>>, vector<8x8xf32>
    %3 = vector.shape_cast %2 : vector<8x8xf32> to vector<1x8x8xf32>
    %c0_4 = arith.constant 0 : index
    %c0_5 = arith.constant 0 : index
    %c0_6 = arith.constant 0 : index
    %c0_7 = arith.constant 0 : index
    %4 = vector.load %arg3[%c0_4, %c0_5, %c0_6, %c0_7] : memref<2x6x32x16xf32, #tpu.memory_space<vmem>>, vector<1x6x32x16xf32>
    %5 = vector.shape_cast %4 : vector<1x6x32x16xf32> to vector<6x32x16xf32>
    %c0_8 = arith.constant 0 : index
    %c0_9 = arith.constant 0 : index
    %c0_10 = arith.constant 0 : index
    %c0_11 = arith.constant 0 : index
    %6 = vector.load %arg4[%c0_8, %c0_9, %c0_10, %c0_11] : memref<2x6x1x16xf32, #tpu.memory_space<vmem>>, vector<1x6x1x16xf32>
    %7 = vector.shape_cast %6 : vector<1x6x1x16xf32> to vector<6x1x16xf32>
    %8 = vector.shape_cast %1 : vector<8x32xf32> to vector<1x8x32xf32>
    %9 = vector.shape_cast %8 : vector<1x8x32xf32> to vector<1x8x32xf32>
    %10 = vector.broadcast %9 : vector<1x8x32xf32> to vector<6x8x32xf32>
    %cst = arith.constant dense<0.000000e+00> : vector<6x8x16xf32>
    %11 = tpu.matmul %10, %5, %cst {dimension_numbers = #tpu.dot_dimension_numbers<[2], [1], [1], [2], [0, 0, 0, 1, 1, 2], [0], [0]>} : vector<6x8x32xf32>, vector<6x32x16xf32>, vector<6x8x16xf32> -> vector<6x8x16xf32>
    %12 = vector.broadcast %7 : vector<6x1x16xf32> to vector<6x8x16xf32>
    %13 = arith.addf %11, %12 : vector<6x8x16xf32>
    %14 = vector.extract_strided_slice %13 {offsets = [0, 0, 0], sizes = [2, 8, 16], strides = [1, 1, 1]} : vector<6x8x16xf32> to vector<2x8x16xf32>
    %15 = vector.extract_strided_slice %13 {offsets = [2, 0, 0], sizes = [2, 8, 16], strides = [1, 1, 1]} : vector<6x8x16xf32> to vector<2x8x16xf32>
    %16 = vector.extract_strided_slice %13 {offsets = [4, 0, 0], sizes = [2, 8, 16], strides = [1, 1, 1]} : vector<6x8x16xf32> to vector<2x8x16xf32>
    %cst_12 = arith.constant dense<0.000000e+00> : vector<2x8x8xf32>
    %17 = tpu.matmul %14, %15, %cst_12 {dimension_numbers = #tpu.dot_dimension_numbers<[2], [2], [1], [1], [0, 0, 0, 1, 1, 1], [0], [0]>} : vector<2x8x16xf32>, vector<2x8x16xf32>, vector<2x8x8xf32> -> vector<2x8x8xf32>
    %18 = vector.broadcast %3 : vector<1x8x8xf32> to vector<2x8x8xf32>
    %19 = arith.addf %17, %18 : vector<2x8x8xf32>
    %cst_13 = arith.constant dense<0xFF800000> : vector<2x8xf32>
    %20 = vector.multi_reduction <maximumf>, %19, %cst_13 [2] : vector<2x8x8xf32> to vector<2x8xf32>
    %21 = vector.shape_cast %20 : vector<2x8xf32> to vector<2x8x1xf32>
    %22 = vector.broadcast %21 : vector<2x8x1xf32> to vector<2x8x8xf32>
    %23 = arith.subf %19, %22 : vector<2x8x8xf32>
    %24 = math.exp %23 : vector<2x8x8xf32>
    %cst_14 = arith.constant dense<0.000000e+00> : vector<2x8xf32>
    %25 = vector.multi_reduction <add>, %24, %cst_14 [2] : vector<2x8x8xf32> to vector<2x8xf32>
    %26 = vector.shape_cast %25 : vector<2x8xf32> to vector<2x8x1xf32>
    %27 = tpu.reciprocal %26 {approx = true} : vector<2x8x1xf32> -> vector<2x8x1xf32>
    %28 = vector.broadcast %27 : vector<2x8x1xf32> to vector<2x8x8xf32>
    %29 = arith.mulf %24, %28 : vector<2x8x8xf32>
    %cst_15 = arith.constant dense<0.000000e+00> : vector<2x8x16xf32>
    %30 = tpu.matmul %29, %16, %cst_15 {dimension_numbers = #tpu.dot_dimension_numbers<[2], [1], [1], [2], [0, 0, 0, 1, 1, 2], [0], [0]>} : vector<2x8x8xf32>, vector<2x8x16xf32>, vector<2x8x16xf32> -> vector<2x8x16xf32>
    %c0_16 = arith.constant 0 : index
    %c0_17 = arith.constant 0 : index
    %c0_18 = arith.constant 0 : index
    %c0_19 = arith.constant 0 : index
    %31 = vector.load %arg5[%c0_16, %c0_17, %c0_18, %c0_19] : memref<2x2x16x32xf32, #tpu.memory_space<vmem>>, vector<1x2x16x32xf32>
    %32 = vector.shape_cast %31 : vector<1x2x16x32xf32> to vector<2x16x32xf32>
    %cst_20 = arith.constant dense<0.000000e+00> : vector<2x8x32xf32>
    %33 = tpu.matmul %30, %32, %cst_20 {dimension_numbers = #tpu.dot_dimension_numbers<[2], [1], [1], [2], [0, 0, 0, 1, 1, 2], [0], [0]>} : vector<2x8x16xf32>, vector<2x16x32xf32>, vector<2x8x32xf32> -> vector<2x8x32xf32>
    %cst_21 = arith.constant dense<0.000000e+00> : vector<8x32xf32>
    %34 = vector.multi_reduction <add>, %33, %cst_21 [0] : vector<2x8x32xf32> to vector<8x32xf32>
    %c0_22 = arith.constant 0 : index
    %c0_23 = arith.constant 0 : index
    %c0_24 = arith.constant 0 : index
    %35 = vector.load %arg6[%c0_22, %c0_23, %c0_24] : memref<2x1x32xf32, #tpu.memory_space<vmem>>, vector<1x1x32xf32>
    %36 = vector.shape_cast %35 : vector<1x1x32xf32> to vector<1x32xf32>
    %37 = vector.broadcast %36 : vector<1x32xf32> to vector<8x32xf32>
    %38 = arith.addf %34, %37 : vector<8x32xf32>
    %39 = arith.addf %1, %38 : vector<8x32xf32>
    %c0_25 = arith.constant 0 : index
    %c0_26 = arith.constant 0 : index
    %c0_27 = arith.constant 0 : index
    %40 = vector.load %arg7[%c0_25, %c0_26, %c0_27] : memref<2x1x32xf32, #tpu.memory_space<vmem>>, vector<1x1x32xf32>
    %41 = vector.shape_cast %40 : vector<1x1x32xf32> to vector<1x32xf32>
    %c0_28 = arith.constant 0 : index
    %c0_29 = arith.constant 0 : index
    %c0_30 = arith.constant 0 : index
    %42 = vector.load %arg8[%c0_28, %c0_29, %c0_30] : memref<2x1x32xf32, #tpu.memory_space<vmem>>, vector<1x1x32xf32>
    %43 = vector.shape_cast %42 : vector<1x1x32xf32> to vector<1x32xf32>
    %cst_31 = arith.constant dense<0.000000e+00> : vector<8xf32>
    %44 = vector.multi_reduction <add>, %39, %cst_31 [1] : vector<8x32xf32> to vector<8xf32>
    %45 = vector.shape_cast %44 : vector<8xf32> to vector<8x1xf32>
    %cst_32 = arith.constant 3.200000e+01 : f32
    %46 = vector.broadcast %cst_32 : f32 to vector<8x1xf32>
    %47 = arith.divf %45, %46 : vector<8x1xf32>
    %48 = vector.broadcast %47 : vector<8x1xf32> to vector<8x32xf32>
    %49 = arith.subf %39, %48 : vector<8x32xf32>
    %50 = arith.mulf %49, %49 : vector<8x32xf32>
    %cst_33 = arith.constant dense<0.000000e+00> : vector<8xf32>
    %51 = vector.multi_reduction <add>, %50, %cst_33 [1] : vector<8x32xf32> to vector<8xf32>
    %52 = vector.shape_cast %51 : vector<8xf32> to vector<8x1xf32>
    %cst_34 = arith.constant 3.200000e+01 : f32
    %53 = vector.broadcast %cst_34 : f32 to vector<8x1xf32>
    %54 = arith.divf %52, %53 : vector<8x1xf32>
    %55 = vector.broadcast %47 : vector<8x1xf32> to vector<8x32xf32>
    %56 = arith.subf %39, %55 : vector<8x32xf32>
    %cst_35 = arith.constant 9.99999974E-6 : f32
    %57 = vector.broadcast %cst_35 : f32 to vector<8x1xf32>
    %58 = arith.addf %54, %57 : vector<8x1xf32>
    %59 = math.rsqrt %58 : vector<8x1xf32>
    %60 = vector.broadcast %59 : vector<8x1xf32> to vector<8x32xf32>
    %61 = arith.mulf %56, %60 : vector<8x32xf32>
    %62 = vector.broadcast %41 : vector<1x32xf32> to vector<8x32xf32>
    %63 = arith.mulf %61, %62 : vector<8x32xf32>
    %64 = vector.broadcast %43 : vector<1x32xf32> to vector<8x32xf32>
    %65 = arith.addf %63, %64 : vector<8x32xf32>
    %c0_36 = arith.constant 0 : index
    %c0_37 = arith.constant 0 : index
    %c0_38 = arith.constant 0 : index
    %66 = vector.load %arg9[%c0_36, %c0_37, %c0_38] : memref<2x32x32xf32, #tpu.memory_space<vmem>>, vector<1x32x32xf32>
    %67 = vector.shape_cast %66 : vector<1x32x32xf32> to vector<32x32xf32>
    %cst_39 = arith.constant dense<0.000000e+00> : vector<8x32xf32>
    %68 = tpu.matmul %65, %67, %cst_39 {dimension_numbers = #tpu.dot_dimension_numbers<[1], [0], [0], [1], [0, 0, 1, 1], [], []>} : vector<8x32xf32>, vector<32x32xf32>, vector<8x32xf32> -> vector<8x32xf32>
    %c0_40 = arith.constant 0 : index
    %c0_41 = arith.constant 0 : index
    %c0_42 = arith.constant 0 : index
    %69 = vector.load %arg10[%c0_40, %c0_41, %c0_42] : memref<2x1x32xf32, #tpu.memory_space<vmem>>, vector<1x1x32xf32>
    %70 = vector.shape_cast %69 : vector<1x1x32xf32> to vector<1x32xf32>
    %71 = vector.broadcast %70 : vector<1x32xf32> to vector<8x32xf32>
    %72 = arith.addf %68, %71 : vector<8x32xf32>
    %cst_43 = arith.constant 0.000000e+00 : f32
    %73 = vector.broadcast %cst_43 : f32 to vector<8x32xf32>
    %74 = arith.maximumf %72, %73 : vector<8x32xf32>
    %c0_44 = arith.constant 0 : index
    %c0_45 = arith.constant 0 : index
    %c0_46 = arith.constant 0 : index
    %75 = vector.load %arg11[%c0_44, %c0_45, %c0_46] : memref<2x32x32xf32, #tpu.memory_space<vmem>>, vector<1x32x32xf32>
    %76 = vector.shape_cast %75 : vector<1x32x32xf32> to vector<32x32xf32>
    %cst_47 = arith.constant dense<0.000000e+00> : vector<8x32xf32>
    %77 = tpu.matmul %74, %76, %cst_47 {dimension_numbers = #tpu.dot_dimension_numbers<[1], [0], [0], [1], [0, 0, 1, 1], [], []>} : vector<8x32xf32>, vector<32x32xf32>, vector<8x32xf32> -> vector<8x32xf32>
    %c0_48 = arith.constant 0 : index
    %c0_49 = arith.constant 0 : index
    %c0_50 = arith.constant 0 : index
    %78 = vector.load %arg12[%c0_48, %c0_49, %c0_50] : memref<2x1x32xf32, #tpu.memory_space<vmem>>, vector<1x1x32xf32>
    %79 = vector.shape_cast %78 : vector<1x1x32xf32> to vector<1x32xf32>
    %80 = vector.broadcast %79 : vector<1x32xf32> to vector<8x32xf32>
    %81 = arith.addf %77, %80 : vector<8x32xf32>
    %82 = arith.addf %65, %81 : vector<8x32xf32>
    %c0_51 = arith.constant 0 : index
    %c0_52 = arith.constant 0 : index
    %c0_53 = arith.constant 0 : index
    %83 = vector.load %arg13[%c0_51, %c0_52, %c0_53] : memref<2x1x32xf32, #tpu.memory_space<vmem>>, vector<1x1x32xf32>
    %84 = vector.shape_cast %83 : vector<1x1x32xf32> to vector<1x32xf32>
    %c0_54 = arith.constant 0 : index
    %c0_55 = arith.constant 0 : index
    %c0_56 = arith.constant 0 : index
    %85 = vector.load %arg14[%c0_54, %c0_55, %c0_56] : memref<2x1x32xf32, #tpu.memory_space<vmem>>, vector<1x1x32xf32>
    %86 = vector.shape_cast %85 : vector<1x1x32xf32> to vector<1x32xf32>
    %cst_57 = arith.constant dense<0.000000e+00> : vector<8xf32>
    %87 = vector.multi_reduction <add>, %82, %cst_57 [1] : vector<8x32xf32> to vector<8xf32>
    %88 = vector.shape_cast %87 : vector<8xf32> to vector<8x1xf32>
    %cst_58 = arith.constant 3.200000e+01 : f32
    %89 = vector.broadcast %cst_58 : f32 to vector<8x1xf32>
    %90 = arith.divf %88, %89 : vector<8x1xf32>
    %91 = vector.broadcast %90 : vector<8x1xf32> to vector<8x32xf32>
    %92 = arith.subf %82, %91 : vector<8x32xf32>
    %93 = arith.mulf %92, %92 : vector<8x32xf32>
    %cst_59 = arith.constant dense<0.000000e+00> : vector<8xf32>
    %94 = vector.multi_reduction <add>, %93, %cst_59 [1] : vector<8x32xf32> to vector<8xf32>
    %95 = vector.shape_cast %94 : vector<8xf32> to vector<8x1xf32>
    %cst_60 = arith.constant 3.200000e+01 : f32
    %96 = vector.broadcast %cst_60 : f32 to vector<8x1xf32>
    %97 = arith.divf %95, %96 : vector<8x1xf32>
    %98 = vector.broadcast %90 : vector<8x1xf32> to vector<8x32xf32>
    %99 = arith.subf %82, %98 : vector<8x32xf32>
    %cst_61 = arith.constant 9.99999974E-6 : f32
    %100 = vector.broadcast %cst_61 : f32 to vector<8x1xf32>
    %101 = arith.addf %97, %100 : vector<8x1xf32>
    %102 = math.rsqrt %101 : vector<8x1xf32>
    %103 = vector.broadcast %102 : vector<8x1xf32> to vector<8x32xf32>
    %104 = arith.mulf %99, %103 : vector<8x32xf32>
    %105 = vector.broadcast %84 : vector<1x32xf32> to vector<8x32xf32>
    %106 = arith.mulf %104, %105 : vector<8x32xf32>
    %107 = vector.broadcast %86 : vector<1x32xf32> to vector<8x32xf32>
    %108 = arith.addf %106, %107 : vector<8x32xf32>
    %c1 = arith.constant 1 : index
    %c0_62 = arith.constant 0 : index
    %c0_63 = arith.constant 0 : index
    %c0_64 = arith.constant 0 : index
    %109 = vector.load %arg3[%c1, %c0_62, %c0_63, %c0_64] : memref<2x6x32x16xf32, #tpu.memory_space<vmem>>, vector<1x6x32x16xf32>
    %110 = vector.shape_cast %109 : vector<1x6x32x16xf32> to vector<6x32x16xf32>
    %c1_65 = arith.constant 1 : index
    %c0_66 = arith.constant 0 : index
    %c0_67 = arith.constant 0 : index
    %c0_68 = arith.constant 0 : index
    %111 = vector.load %arg4[%c1_65, %c0_66, %c0_67, %c0_68] : memref<2x6x1x16xf32, #tpu.memory_space<vmem>>, vector<1x6x1x16xf32>
    %112 = vector.shape_cast %111 : vector<1x6x1x16xf32> to vector<6x1x16xf32>
    %113 = vector.shape_cast %108 : vector<8x32xf32> to vector<1x8x32xf32>
    %114 = vector.shape_cast %113 : vector<1x8x32xf32> to vector<1x8x32xf32>
    %115 = vector.broadcast %114 : vector<1x8x32xf32> to vector<6x8x32xf32>
    %cst_69 = arith.constant dense<0.000000e+00> : vector<6x8x16xf32>
    %116 = tpu.matmul %115, %110, %cst_69 {dimension_numbers = #tpu.dot_dimension_numbers<[2], [1], [1], [2], [0, 0, 0, 1, 1, 2], [0], [0]>} : vector<6x8x32xf32>, vector<6x32x16xf32>, vector<6x8x16xf32> -> vector<6x8x16xf32>
    %117 = vector.broadcast %112 : vector<6x1x16xf32> to vector<6x8x16xf32>
    %118 = arith.addf %116, %117 : vector<6x8x16xf32>
    %119 = vector.extract_strided_slice %118 {offsets = [0, 0, 0], sizes = [2, 8, 16], strides = [1, 1, 1]} : vector<6x8x16xf32> to vector<2x8x16xf32>
    %120 = vector.extract_strided_slice %118 {offsets = [2, 0, 0], sizes = [2, 8, 16], strides = [1, 1, 1]} : vector<6x8x16xf32> to vector<2x8x16xf32>
    %121 = vector.extract_strided_slice %118 {offsets = [4, 0, 0], sizes = [2, 8, 16], strides = [1, 1, 1]} : vector<6x8x16xf32> to vector<2x8x16xf32>
    %cst_70 = arith.constant dense<0.000000e+00> : vector<2x8x8xf32>
    %122 = tpu.matmul %119, %120, %cst_70 {dimension_numbers = #tpu.dot_dimension_numbers<[2], [2], [1], [1], [0, 0, 0, 1, 1, 1], [0], [0]>} : vector<2x8x16xf32>, vector<2x8x16xf32>, vector<2x8x8xf32> -> vector<2x8x8xf32>
    %123 = vector.broadcast %3 : vector<1x8x8xf32> to vector<2x8x8xf32>
    %124 = arith.addf %122, %123 : vector<2x8x8xf32>
    %cst_71 = arith.constant dense<0xFF800000> : vector<2x8xf32>
    %125 = vector.multi_reduction <maximumf>, %124, %cst_71 [2] : vector<2x8x8xf32> to vector<2x8xf32>
    %126 = vector.shape_cast %125 : vector<2x8xf32> to vector<2x8x1xf32>
    %127 = vector.broadcast %126 : vector<2x8x1xf32> to vector<2x8x8xf32>
    %128 = arith.subf %124, %127 : vector<2x8x8xf32>
    %129 = math.exp %128 : vector<2x8x8xf32>
    %cst_72 = arith.constant dense<0.000000e+00> : vector<2x8xf32>
    %130 = vector.multi_reduction <add>, %129, %cst_72 [2] : vector<2x8x8xf32> to vector<2x8xf32>
    %131 = vector.shape_cast %130 : vector<2x8xf32> to vector<2x8x1xf32>
    %132 = tpu.reciprocal %131 {approx = true} : vector<2x8x1xf32> -> vector<2x8x1xf32>
    %133 = vector.broadcast %132 : vector<2x8x1xf32> to vector<2x8x8xf32>
    %134 = arith.mulf %129, %133 : vector<2x8x8xf32>
    %cst_73 = arith.constant dense<0.000000e+00> : vector<2x8x16xf32>
    %135 = tpu.matmul %134, %121, %cst_73 {dimension_numbers = #tpu.dot_dimension_numbers<[2], [1], [1], [2], [0, 0, 0, 1, 1, 2], [0], [0]>} : vector<2x8x8xf32>, vector<2x8x16xf32>, vector<2x8x16xf32> -> vector<2x8x16xf32>
    %c1_74 = arith.constant 1 : index
    %c0_75 = arith.constant 0 : index
    %c0_76 = arith.constant 0 : index
    %c0_77 = arith.constant 0 : index
    %136 = vector.load %arg5[%c1_74, %c0_75, %c0_76, %c0_77] : memref<2x2x16x32xf32, #tpu.memory_space<vmem>>, vector<1x2x16x32xf32>
    %137 = vector.shape_cast %136 : vector<1x2x16x32xf32> to vector<2x16x32xf32>
    %cst_78 = arith.constant dense<0.000000e+00> : vector<2x8x32xf32>
    %138 = tpu.matmul %135, %137, %cst_78 {dimension_numbers = #tpu.dot_dimension_numbers<[2], [1], [1], [2], [0, 0, 0, 1, 1, 2], [0], [0]>} : vector<2x8x16xf32>, vector<2x16x32xf32>, vector<2x8x32xf32> -> vector<2x8x32xf32>
    %cst_79 = arith.constant dense<0.000000e+00> : vector<8x32xf32>
    %139 = vector.multi_reduction <add>, %138, %cst_79 [0] : vector<2x8x32xf32> to vector<8x32xf32>
    %c1_80 = arith.constant 1 : index
    %c0_81 = arith.constant 0 : index
    %c0_82 = arith.constant 0 : index
    %140 = vector.load %arg6[%c1_80, %c0_81, %c0_82] : memref<2x1x32xf32, #tpu.memory_space<vmem>>, vector<1x1x32xf32>
    %141 = vector.shape_cast %140 : vector<1x1x32xf32> to vector<1x32xf32>
    %142 = vector.broadcast %141 : vector<1x32xf32> to vector<8x32xf32>
    %143 = arith.addf %139, %142 : vector<8x32xf32>
    %144 = arith.addf %108, %143 : vector<8x32xf32>
    %c1_83 = arith.constant 1 : index
    %c0_84 = arith.constant 0 : index
    %c0_85 = arith.constant 0 : index
    %145 = vector.load %arg7[%c1_83, %c0_84, %c0_85] : memref<2x1x32xf32, #tpu.memory_space<vmem>>, vector<1x1x32xf32>
    %146 = vector.shape_cast %145 : vector<1x1x32xf32> to vector<1x32xf32>
    %c1_86 = arith.constant 1 : index
    %c0_87 = arith.constant 0 : index
    %c0_88 = arith.constant 0 : index
    %147 = vector.load %arg8[%c1_86, %c0_87, %c0_88] : memref<2x1x32xf32, #tpu.memory_space<vmem>>, vector<1x1x32xf32>
    %148 = vector.shape_cast %147 : vector<1x1x32xf32> to vector<1x32xf32>
    %cst_89 = arith.constant dense<0.000000e+00> : vector<8xf32>
    %149 = vector.multi_reduction <add>, %144, %cst_89 [1] : vector<8x32xf32> to vector<8xf32>
    %150 = vector.shape_cast %149 : vector<8xf32> to vector<8x1xf32>
    %cst_90 = arith.constant 3.200000e+01 : f32
    %151 = vector.broadcast %cst_90 : f32 to vector<8x1xf32>
    %152 = arith.divf %150, %151 : vector<8x1xf32>
    %153 = vector.broadcast %152 : vector<8x1xf32> to vector<8x32xf32>
    %154 = arith.subf %144, %153 : vector<8x32xf32>
    %155 = arith.mulf %154, %154 : vector<8x32xf32>
    %cst_91 = arith.constant dense<0.000000e+00> : vector<8xf32>
    %156 = vector.multi_reduction <add>, %155, %cst_91 [1] : vector<8x32xf32> to vector<8xf32>
    %157 = vector.shape_cast %156 : vector<8xf32> to vector<8x1xf32>
    %cst_92 = arith.constant 3.200000e+01 : f32
    %158 = vector.broadcast %cst_92 : f32 to vector<8x1xf32>
    %159 = arith.divf %157, %158 : vector<8x1xf32>
    %160 = vector.broadcast %152 : vector<8x1xf32> to vector<8x32xf32>
    %161 = arith.subf %144, %160 : vector<8x32xf32>
    %cst_93 = arith.constant 9.99999974E-6 : f32
    %162 = vector.broadcast %cst_93 : f32 to vector<8x1xf32>
    %163 = arith.addf %159, %162 : vector<8x1xf32>
    %164 = math.rsqrt %163 : vector<8x1xf32>
    %165 = vector.broadcast %164 : vector<8x1xf32> to vector<8x32xf32>
    %166 = arith.mulf %161, %165 : vector<8x32xf32>
    %167 = vector.broadcast %146 : vector<1x32xf32> to vector<8x32xf32>
    %168 = arith.mulf %166, %167 : vector<8x32xf32>
    %169 = vector.broadcast %148 : vector<1x32xf32> to vector<8x32xf32>
    %170 = arith.addf %168, %169 : vector<8x32xf32>
    %c1_94 = arith.constant 1 : index
    %c0_95 = arith.constant 0 : index
    %c0_96 = arith.constant 0 : index
    %171 = vector.load %arg9[%c1_94, %c0_95, %c0_96] : memref<2x32x32xf32, #tpu.memory_space<vmem>>, vector<1x32x32xf32>
    %172 = vector.shape_cast %171 : vector<1x32x32xf32> to vector<32x32xf32>
    %cst_97 = arith.constant dense<0.000000e+00> : vector<8x32xf32>
    %173 = tpu.matmul %170, %172, %cst_97 {dimension_numbers = #tpu.dot_dimension_numbers<[1], [0], [0], [1], [0, 0, 1, 1], [], []>} : vector<8x32xf32>, vector<32x32xf32>, vector<8x32xf32> -> vector<8x32xf32>
    %c1_98 = arith.constant 1 : index
    %c0_99 = arith.constant 0 : index
    %c0_100 = arith.constant 0 : index
    %174 = vector.load %arg10[%c1_98, %c0_99, %c0_100] : memref<2x1x32xf32, #tpu.memory_space<vmem>>, vector<1x1x32xf32>
    %175 = vector.shape_cast %174 : vector<1x1x32xf32> to vector<1x32xf32>
    %176 = vector.broadcast %175 : vector<1x32xf32> to vector<8x32xf32>
    %177 = arith.addf %173, %176 : vector<8x32xf32>
    %cst_101 = arith.constant 0.000000e+00 : f32
    %178 = vector.broadcast %cst_101 : f32 to vector<8x32xf32>
    %179 = arith.maximumf %177, %178 : vector<8x32xf32>
    %c1_102 = arith.constant 1 : index
    %c0_103 = arith.constant 0 : index
    %c0_104 = arith.constant 0 : index
    %180 = vector.load %arg11[%c1_102, %c0_103, %c0_104] : memref<2x32x32xf32, #tpu.memory_space<vmem>>, vector<1x32x32xf32>
    %181 = vector.shape_cast %180 : vector<1x32x32xf32> to vector<32x32xf32>
    %cst_105 = arith.constant dense<0.000000e+00> : vector<8x32xf32>
    %182 = tpu.matmul %179, %181, %cst_105 {dimension_numbers = #tpu.dot_dimension_numbers<[1], [0], [0], [1], [0, 0, 1, 1], [], []>} : vector<8x32xf32>, vector<32x32xf32>, vector<8x32xf32> -> vector<8x32xf32>
    %c1_106 = arith.constant 1 : index
    %c0_107 = arith.constant 0 : index
    %c0_108 = arith.constant 0 : index
    %183 = vector.load %arg12[%c1_106, %c0_107, %c0_108] : memref<2x1x32xf32, #tpu.memory_space<vmem>>, vector<1x1x32xf32>
    %184 = vector.shape_cast %183 : vector<1x1x32xf32> to vector<1x32xf32>
    %185 = vector.broadcast %184 : vector<1x32xf32> to vector<8x32xf32>
    %186 = arith.addf %182, %185 : vector<8x32xf32>
    %187 = arith.addf %170, %186 : vector<8x32xf32>
    %c1_109 = arith.constant 1 : index
    %c0_110 = arith.constant 0 : index
    %c0_111 = arith.constant 0 : index
    %188 = vector.load %arg13[%c1_109, %c0_110, %c0_111] : memref<2x1x32xf32, #tpu.memory_space<vmem>>, vector<1x1x32xf32>
    %189 = vector.shape_cast %188 : vector<1x1x32xf32> to vector<1x32xf32>
    %c1_112 = arith.constant 1 : index
    %c0_113 = arith.constant 0 : index
    %c0_114 = arith.constant 0 : index
    %190 = vector.load %arg14[%c1_112, %c0_113, %c0_114] : memref<2x1x32xf32, #tpu.memory_space<vmem>>, vector<1x1x32xf32>
    %191 = vector.shape_cast %190 : vector<1x1x32xf32> to vector<1x32xf32>
    %cst_115 = arith.constant dense<0.000000e+00> : vector<8xf32>
    %192 = vector.multi_reduction <add>, %187, %cst_115 [1] : vector<8x32xf32> to vector<8xf32>
    %193 = vector.shape_cast %192 : vector<8xf32> to vector<8x1xf32>
    %cst_116 = arith.constant 3.200000e+01 : f32
    %194 = vector.broadcast %cst_116 : f32 to vector<8x1xf32>
    %195 = arith.divf %193, %194 : vector<8x1xf32>
    %196 = vector.broadcast %195 : vector<8x1xf32> to vector<8x32xf32>
    %197 = arith.subf %187, %196 : vector<8x32xf32>
    %198 = arith.mulf %197, %197 : vector<8x32xf32>
    %cst_117 = arith.constant dense<0.000000e+00> : vector<8xf32>
    %199 = vector.multi_reduction <add>, %198, %cst_117 [1] : vector<8x32xf32> to vector<8xf32>
    %200 = vector.shape_cast %199 : vector<8xf32> to vector<8x1xf32>
    %cst_118 = arith.constant 3.200000e+01 : f32
    %201 = vector.broadcast %cst_118 : f32 to vector<8x1xf32>
    %202 = arith.divf %200, %201 : vector<8x1xf32>
    %203 = vector.broadcast %195 : vector<8x1xf32> to vector<8x32xf32>
    %204 = arith.subf %187, %203 : vector<8x32xf32>
    %cst_119 = arith.constant 9.99999974E-6 : f32
    %205 = vector.broadcast %cst_119 : f32 to vector<8x1xf32>
    %206 = arith.addf %202, %205 : vector<8x1xf32>
    %207 = math.rsqrt %206 : vector<8x1xf32>
    %208 = vector.broadcast %207 : vector<8x1xf32> to vector<8x32xf32>
    %209 = arith.mulf %204, %208 : vector<8x32xf32>
    %210 = vector.broadcast %189 : vector<1x32xf32> to vector<8x32xf32>
    %211 = arith.mulf %209, %210 : vector<8x32xf32>
    %212 = vector.broadcast %191 : vector<1x32xf32> to vector<8x32xf32>
    %213 = arith.addf %211, %212 : vector<8x32xf32>
    %c0_120 = arith.constant 0 : index
    %c0_121 = arith.constant 0 : index
    %214 = vector.load %arg15[%c0_120, %c0_121] : memref<32x256xf32, #tpu.memory_space<vmem>>, vector<32x256xf32>
    %cst_122 = arith.constant dense<0.000000e+00> : vector<8x256xf32>
    %215 = tpu.matmul %213, %214, %cst_122 {dimension_numbers = #tpu.dot_dimension_numbers<[1], [0], [0], [1], [0, 0, 1, 1], [], []>} : vector<8x32xf32>, vector<32x256xf32>, vector<8x256xf32> -> vector<8x256xf32>
    %c0_123 = arith.constant 0 : index
    %c0_124 = arith.constant 0 : index
    %216 = vector.load %arg16[%c0_123, %c0_124] : memref<1x256xf32, #tpu.memory_space<vmem>>, vector<1x256xf32>
    %217 = vector.broadcast %216 : vector<1x256xf32> to vector<8x256xf32>
    %218 = arith.addf %215, %217 : vector<8x256xf32>
    %c0_125 = arith.constant 0 : index
    %c0_126 = arith.constant 0 : index
    %c0_127 = arith.constant 0 : index
    %219 = vector.load %arg17[%c0_125, %c0_126, %c0_127] : memref<1x8x256xf32, #tpu.memory_space<vmem>>, vector<1x8x256xf32>
    %220 = vector.shape_cast %219 : vector<1x8x256xf32> to vector<8x256xf32>
    %221 = vector.shape_cast %218 : vector<8x256xf32> to vector<1x8x256xf32>
    tpu.vector_store %arg17[%c0_125, %c0_126, %c0_127], %221 {strides = array<i32>} : memref<1x8x256xf32, #tpu.memory_space<vmem>>, vector<1x8x256xf32>,
    return
  }
  func.func @transform_0(%arg0: i32) -> (i32, i32, i32) {
    %c0_i32 = arith.constant 0 : i32
    %c0_i32_0 = arith.constant 0 : i32
    %c0_i32_1 = arith.constant 0 : i32
    return %arg0, %c0_i32, %c0_i32_0 : i32, i32, i32
  }
  func.func @transform_1(%arg0: i32) -> (i32, i32) {
    %c0_i32 = arith.constant 0 : i32
    %c0_i32_0 = arith.constant 0 : i32
    %c0_i32_1 = arith.constant 0 : i32
    return %c0_i32, %c0_i32_0 : i32, i32
  }
  func.func @transform_2(%arg0: i32) -> (i32, i32, i32, i32) {
    %c0_i32 = arith.constant 0 : i32
    %c0_i32_0 = arith.constant 0 : i32
    %c0_i32_1 = arith.constant 0 : i32
    %c0_i32_2 = arith.constant 0 : i32
    %c0_i32_3 = arith.constant 0 : i32
    return %c0_i32, %c0_i32_0, %c0_i32_1, %c0_i32_2 : i32, i32, i32, i32
  }
  func.func @transform_3(%arg0: i32) -> (i32, i32, i32, i32) {
    %c0_i32 = arith.constant 0 : i32
    %c0_i32_0 = arith.constant 0 : i32
    %c0_i32_1 = arith.constant 0 : i32
    %c0_i32_2 = arith.constant 0 : i32
    %c0_i32_3 = arith.constant 0 : i32
    return %c0_i32, %c0_i32_0, %c0_i32_1, %c0_i32_2 : i32, i32, i32, i32
  }
  func.func @transform_4(%arg0: i32) -> (i32, i32, i32, i32) {
    %c0_i32 = arith.constant 0 : i32
    %c0_i32_0 = arith.constant 0 : i32
    %c0_i32_1 = arith.constant 0 : i32
    %c0_i32_2 = arith.constant 0 : i32
    %c0_i32_3 = arith.constant 0 : i32
    return %c0_i32, %c0_i32_0, %c0_i32_1, %c0_i32_2 : i32, i32, i32, i32
  }
  func.func @transform_5(%arg0: i32) -> (i32, i32, i32) {
    %c0_i32 = arith.constant 0 : i32
    %c0_i32_0 = arith.constant 0 : i32
    %c0_i32_1 = arith.constant 0 : i32
    %c0_i32_2 = arith.constant 0 : i32
    return %c0_i32, %c0_i32_0, %c0_i32_1 : i32, i32, i32
  }
  func.func @transform_6(%arg0: i32) -> (i32, i32, i32) {
    %c0_i32 = arith.constant 0 : i32
    %c0_i32_0 = arith.constant 0 : i32
    %c0_i32_1 = arith.constant 0 : i32
    %c0_i32_2 = arith.constant 0 : i32
    return %c0_i32, %c0_i32_0, %c0_i32_1 : i32, i32, i32
  }
  func.func @transform_7(%arg0: i32) -> (i32, i32, i32) {
    %c0_i32 = arith.constant 0 : i32
    %c0_i32_0 = arith.constant 0 : i32
    %c0_i32_1 = arith.constant 0 : i32
    %c0_i32_2 = arith.constant 0 : i32
    return %c0_i32, %c0_i32_0, %c0_i32_1 : i32, i32, i32
  }
  func.func @transform_8(%arg0: i32) -> (i32, i32, i32) {
    %c0_i32 = arith.constant 0 : i32
    %c0_i32_0 = arith.constant 0 : i32
    %c0_i32_1 = arith.constant 0 : i32
    %c0_i32_2 = arith.constant 0 : i32
    return %c0_i32, %c0_i32_0, %c0_i32_1 : i32, i32, i32
  }
  func.func @transform_9(%arg0: i32) -> (i32, i32, i32) {
    %c0_i32 = arith.constant 0 : i32
    %c0_i32_0 = arith.constant 0 : i32
    %c0_i32_1 = arith.constant 0 : i32
    %c0_i32_2 = arith.constant 0 : i32
    return %c0_i32, %c0_i32_0, %c0_i32_1 : i32, i32, i32
  }
  func.func @transform_10(%arg0: i32) -> (i32, i32, i32) {
    %c0_i32 = arith.constant 0 : i32
    %c0_i32_0 = arith.constant 0 : i32
    %c0_i32_1 = arith.constant 0 : i32
    %c0_i32_2 = arith.constant 0 : i32
    return %c0_i32, %c0_i32_0, %c0_i32_1 : i32, i32, i32
  }
  func.func @transform_11(%arg0: i32) -> (i32, i32, i32) {
    %c0_i32 = arith.constant 0 : i32
    %c0_i32_0 = arith.constant 0 : i32
    %c0_i32_1 = arith.constant 0 : i32
    %c0_i32_2 = arith.constant 0 : i32
    return %c0_i32, %c0_i32_0, %c0_i32_1 : i32, i32, i32
  }
  func.func @transform_12(%arg0: i32) -> (i32, i32, i32) {
    %c0_i32 = arith.constant 0 : i32
    %c0_i32_0 = arith.constant 0 : i32
    %c0_i32_1 = arith.constant 0 : i32
    %c0_i32_2 = arith.constant 0 : i32
    return %c0_i32, %c0_i32_0, %c0_i32_1 : i32, i32, i32
  }
  func.func @transform_13(%arg0: i32) -> (i32, i32, i32) {
    %c0_i32 = arith.constant 0 : i32
    %c0_i32_0 = arith.constant 0 : i32
    %c0_i32_1 = arith.constant 0 : i32
    %c0_i32_2 = arith.constant 0 : i32
    return %c0_i32, %c0_i32_0, %c0_i32_1 : i32, i32, i32
  }
  func.func @transform_14(%arg0: i32) -> (i32, i32) {
    %c0_i32 = arith.constant 0 : i32
    %c0_i32_0 = arith.constant 0 : i32
    %c0_i32_1 = arith.constant 0 : i32
    return %c0_i32, %c0_i32_0 : i32, i32
  }
  func.func @transform_15(%arg0: i32) -> (i32, i32) {
    %c0_i32 = arith.constant 0 : i32
    %c0_i32_0 = arith.constant 0 : i32
    %c0_i32_1 = arith.constant 0 : i32
    return %c0_i32, %c0_i32_0 : i32, i32
  }
  func.func @transform_16(%arg0: i32) -> (i32, i32, i32) {
    %c0_i32 = arith.constant 0 : i32
    %c0_i32_0 = arith.constant 0 : i32
    %c0_i32_1 = arith.constant 0 : i32
    return %arg0, %c0_i32, %c0_i32_0 : i32, i32, i32
  }
}

</mosaic_0001>

<bundles_post_ra>
// kernel: transformer_forward.1
= control target key start
LH: loop header
LB: loop body
LE: loop exit
PB: predicated region body
PF: predicated region fallthrough
CT: control target
= control target key end

     0   :  { %s1862_s21 = smov 0   ;;  %s2300_s0 = inlined_call_operand.vmem [shape: f32[2,8,32], index: 0, kind: input, shape index: {}]   ;;  %s2301_s1 = inlined_call_operand.vmem [shape: f32[8,8], index: 1, kind: input, shape index: {}]   ;;  %s2302_s2 = inlined_call_operand.vmem [shape: f32[2,6,32,16], index: 2, kind: input, shape index: {}]   ;;  %s2303_s3 = inlined_call_operand.vmem [shape: f32[2,6,1,16], index: 3, kind: input, shape index: {}]   ;;  %s2304_s4 = inlined_call_operand.vmem [shape: f32[2,2,16,32], index: 4, kind: input, shape index: {}]   ;;  %s2305_s5 = inlined_call_operand.vmem [shape: f32[2,1,32], index: 5, kind: input, shape index: {}]   ;;  %s2306_s6 = inlined_call_operand.vmem [shape: f32[2,1,32], index: 6, kind: input, shape index: {}]   ;;  %s2307_s7 = inlined_call_operand.vmem [shape: f32[2,1,32], index: 7, kind: input, shape index: {}]   ;;  %s2308_s8 = inlined_call_operand.vmem [shape: f32[2,32,32], index: 8, kind: input, shape index: {}]   ;;  %s2309_s9 = inlined_call_operand.vmem [shape: f32[2,1,32], index: 9, kind: input, shape index: {}]   ;;  %s2310_s10 = inlined_call_operand.vmem [shape: f32[2,32,32], index: 10, kind: input, shape index: {}]   ;;  %s2311_s11 = inlined_call_operand.vmem [shape: f32[2,1,32], index: 11, kind: input, shape index: {}]   ;;  %s2312_s12 = inlined_call_operand.vmem [shape: f32[2,1,32], index: 12, kind: input, shape index: {}]   ;;  %s2313_s13 = inlined_call_operand.vmem [shape: f32[2,1,32], index: 13, kind: input, shape index: {}]   ;;  %s2314_s14 = inlined_call_operand.vmem [shape: f32[32,256], index: 14, kind: input, shape index: {}]   ;;  %s2315_s15 = inlined_call_operand.vmem [shape: f32[1,256], index: 15, kind: input, shape index: {}]   ;;  %s2316_s16 = inlined_call_operand.vmem [shape: f32[2,8,256], index: 16, kind: output, shape index: {}]  }
   0x1   :  { %2317 = sst [smem:[#allocation2_spill]] %s2300_s0 }
   0x2 LB: > { %s1613_s22 = sadd.s32 4294967295, %s1774_s21   ;;  %p1617_p0 = scmp.ge.s32.totalorder %s1774_s21, 1  ;;  %s1774_s21 = sphi %s1862_s21, %s26_s21  }
   0x3   : > { %p461_p1 = scmp.lt.s32.totalorder %s1774_s21, 3 }
   0x5   : > { %p462_p2 = pnand %p1617_p0, %p461_p1 }
   0x6   : > { %p510_p3 = scmp.lt.s32.totalorder (!%p462_p2), %s1613_s22, 1  ;;  %s2318_s26 = sld [smem:[#allocation2_spill]] (!%p462_p2) }
   0x7   : > { %465 = sbr.rel (%p462_p2) target bundleno = 3334 (0xd06), region = 84 }
   0xc   : > { %v532_v0 = vld [vmem:[%s2302_s2 + $0x58] sm:$0xff]  ;;  %v531_v1 = vld [vmem:[%s2302_s2 + $0x50] sm:$0xff]  ;;  %v530_v4 = vld [vmem:[%s2302_s2 + $0x48] sm:$0xff]  ;;  %s2320_s22 = smov (!%p510_p3, %s1613_s22), 1  ;;  %vm569_vm0 = vcmask 261120   ;;  %vm693_vm1 = vcmask 130048  }
   0xd   : > { %625 = vmatpush.msra.mxu2 %v532_v0  ;;  %v536_v2 = vld [vmem:[%s2302_s2 + $0x78] sm:$0xff]  ;;  %v535_v5 = vld [vmem:[%s2302_s2 + $0x70] sm:$0xff]  ;;  %v529_v7 = vld [vmem:[%s2302_s2 + $0x40] sm:$0xff]  ;;  %s1618_s30 = sshll.u32 %s2320_s22, 3  ;;  %vm746_vm2 = vcmask 64512   ;;  %s1706_s23 = sshll.u32 %s2320_s22, 4 }
   0xe   : > { %v524_v3 = vld [vmem:[%s2302_s2 + $0x18] sm:$0xff]  ;;  %645 = vmatpush.msra.mxu3 %v536_v2  ;;  %v523_v6 = vld [vmem:[%s2302_s2 + $0x10] sm:$0xff]  ;;  %v534_v8 = vld [vmem:[%s2302_s2 + $0x68] sm:$0xff]  ;;  %s513_s27 = scalar_lea.vmem %s2318_s26, %s1618_s30  ;;  %s518_s26 = scalar_lea.vmem %s2316_s16, %s1706_s23 }
   0xf   : > { %585 = vmatpush.msra.mxu0 %v524_v3  ;;  %626 = vmatpush.msra.mxu2 %v531_v1  ;;  %v522_v9 = vld [vmem:[%s2302_s2 + $0x8] sm:$0xff]  ;;  %v533_v10 = vld [vmem:[%s2302_s2 + $0x60] sm:$0xff]  ;;  %v528_v11 = vld [vmem:[%s2302_s2 + $0x38] sm:$0xff] }
  0x10   : > { %646 = vmatpush.msra.mxu3 %v535_v5  ;;  %v527_v12 = vld [vmem:[%s2302_s2 + $0x30] sm:$0xff]  ;;  %v521_v13 = vld [vmem:[%s2302_s2] sm:$0xff]  ;;  %605 = vmatpush.msra.mxu1 %v528_v11  ;;  %v526_v14 = vld [vmem:[%s2302_s2 + $0x28] sm:$0xff] }
  0x11   : > { %586 = vmatpush.msra.mxu0 %v523_v6  ;;  %627 = vmatpush.msra.mxu2 %v530_v4  ;;  %v1921_v15 = vld [vmem:[%s513_s27] sm:$0xff]  ;;  %v540_v36 = vld [vmem:[%s2302_s2 + $0x98] sm:$0xff]  ;;  %v539_v37 = vld [vmem:[%s2302_s2 + $0x90] sm:$0xff] }
  0x12   : > { %647 = vmatpush.msra.mxu3 %v534_v8  ;;  %606 = vmatpush.msra.mxu1 %v527_v12  ;;  %v525_v16 = vld [vmem:[%s2302_s2 + $0x20] sm:$0xff]  ;;  %v538_v38 = vld [vmem:[%s2302_s2 + $0x88] sm:$0xff]  ;;  %v544_v40 = vld [vmem:[%s2302_s2 + $0xb8] sm:$0xff] }
  0x13   : > { %587 = vmatpush.msra.mxu0 %v522_v9  ;;  %628 = vmatpush.msra.mxu2 %v529_v7  ;;  %v1716_v17 = vld [vmem:[%s2303_s3 + $0x2] ss:$0 sm:$0xff]  ;;  %v1717_v18 = vld [vmem:[%s2303_s3] ss:$0 sm:$0xff]  ;;  %v1718_v19 = vld [vmem:[%s2303_s3 + $0x3] ss:$0 sm:$0xff] }
  0x14   : > { %1623 = vmatmul.msk.f32.vlgmr.msra.gmra.mxu2 %vm569_vm0, %v1921_v15  ;;  %648 = vmatpush.msra.mxu3 %v533_v10  ;;  %v1719_v21 = vld [vmem:[%s2303_s3 + $0x1] ss:$0 sm:$0xff]  ;;  %v543_v41 = vld [vmem:[%s2302_s2 + $0xb0] sm:$0xff]  ;;  %v542_v42 = vld [vmem:[%s2302_s2 + $0xa8] sm:$0xff] }
  0x15   : > { %588 = vmatpush.msra.mxu0 %v521_v13  ;;  %1624 = vmatmul.msk.f32.vlgmr.msra.gmra.mxu3 %vm569_vm0, %v1921_v15  ;;  %v1953_v29 = vld [vmem:[%s2301_s1] sm:$0xff]  ;;  %v816_v60 = vld [vmem:[%s2304_s4 + $0x8] sm:$0xff]  ;;  %v818_v4 = vld [vmem:[%s2304_s4 + $0x18] sm:$0xff] }
  0x16   : > { %1621 = vmatmul.msk.f32.vlgmr.msra.gmra.mxu0 %vm569_vm0, %v1921_v15  ;;  %607 = vmatpush.msra.mxu1 %v526_v14  ;;  %v537_v39 = vld [vmem:[%s2302_s2 + $0x80] sm:$0xff]  ;;  %v817_v5 = vld [vmem:[%s2304_s4 + $0x10] sm:$0xff] }
  0x17   : > { %665 = vmatpush.msrb.mxu0 %v540_v36  ;;  %v541_v43 = vld [vmem:[%s2302_s2 + $0xa0] sm:$0xff] }
  0x18   : > { %608 = vmatpush.msra.mxu1 %v525_v16  ;;  %v1720_v54 = vld [vmem:[%s2303_s3 + $0x4] ss:$0 sm:$0xff]  ;;  %v1721_v57 = vld [vmem:[%s2303_s3 + $0x5] ss:$0 sm:$0xff]  ;;  %v1722_v10 = vld [vmem:[%s2305_s5] ss:$0 sm:$0xff] }
  0x19   : > { %1622 = vmatmul.msk.f32.vlgmr.msra.gmra.mxu1 %vm569_vm0, %v1921_v15  ;;  %666 = vmatpush.msrb.mxu0 %v539_v37  ;;  %v815_v3 = vld [vmem:[%s2304_s4] sm:$0xff] }
  0x1a   : > { %685 = vmatpush.msrb.mxu1 %v544_v40 }
  0x1b   : > { %667 = vmatpush.msrb.mxu0 %v538_v38 }
  0x1c   : > { %686 = vmatpush.msrb.mxu1 %v543_v41 }
  0x1d   : > { %668 = vmatpush.msrb.mxu0 %v537_v39 }
  0x1e   : > { %1625 = vmatmul.msk.f32.vlgmr.msrb.gmra.mxu0 %vm569_vm0, %v1921_v15  ;;  %687 = vmatpush.msrb.mxu1 %v542_v42 }
  0x20   : > { %688 = vmatpush.msrb.mxu1 %v541_v43 }
  0x21   : > { %1626 = vmatmul.msk.f32.vlgmr.msrb.gmra.mxu1 %vm569_vm0, %v1921_v15 }
  0x93   : > { %v590_v20 = vpop.f32.mrf.mxu0 }
  0x94   : > { %v591_v26 = vadd.f32 %v1717_v18, %v590_v20  ;;  %v1776_v18 = vmov 32.0  }
  0x96   : > { %v610_v23 = vpop.f32.mrf.mxu1 }
  0x97   : > { %v630_v22 = vpop.f32.mrf.mxu2  ;;  %v611_v28 = vadd.f32 %v1719_v21, %v610_v23 }
  0x98   : > { %v631_v24 = vadd.f32 %v1716_v17, %v630_v22  ;;  %v650_v25 = vpop.f32.mrf.mxu3 }
  0x99   : > { %v651_v27 = vadd.f32 %v1718_v19, %v650_v25 }
  0x9a   : > { %1627 = vmatpush.xpose.msk.msrb.mxu2 %vm693_vm1, %v631_v24 }
  0x9b   : > { %1629 = vmatpush.xpose.msk.msrb.mxu3 %vm693_vm1, %v651_v27  ;;  %v670_v55 = vpop.f32.mrf.mxu0 }
  0x9c   : > { %v671_v56 = vadd.f32 %v1720_v54, %v670_v55 }
  0x9d   : > { %1628 = vmatmul.msk.f32.vlgmr.msrb.gmra.mxu2 %vm693_vm1, %v591_v26 }
  0x9e   : > { %1630 = vmatmul.msk.f32.vlgmr.msrb.gmra.mxu3 %vm693_vm1, %v611_v28  ;;  %787 = vmatpush.msra.mxu0 %v671_v56  ;;  %v690_v58 = vpop.f32.mrf.mxu1 }
  0x9f   : > { %v691_v59 = vadd.f32 %v1721_v57, %v690_v58  ;;  %836 = vmatpush.msra.mxu2 %v816_v60  ;;  %859 = vmatpush.msra.mxu3 %v818_v4  ;;  %v1726_v57 = vld [vmem:[%s2311_s11] ss:$0 sm:$0xff]  ;;  %v1644_v4 = vld [vmem:[%s2302_s2 + $0xf8] sm:$0xff] }
  0xa1   : > { %810 = vmatpush.msra.mxu1 %v691_v59  ;;  %837 = vmatpush.msra.mxu2 %v815_v3  ;;  %v1640_v3 = vld [vmem:[%s2302_s2 + $0xd8] sm:$0xff] }
  0xa2   : > { %860 = vmatpush.msra.mxu3 %v817_v5  ;;  %v1648_v5 = vld [vmem:[%s2302_s2 + $0x118] sm:$0xff] }
  0xa3   : > { %1074 = vmatpush.msrb.mxu2 %v1640_v3 }
  0xa4   : > { %1094 = vmatpush.msrb.mxu3 %v1644_v4 }
 0x120   : > { %v717_v30 = vpop.f32.mrf.mxu2 }
 0x121   : > { %v718_v31 = vadd.f32 %v717_v30, %v1953_v29  ;;  %v743_v32 = vpop.f32.mrf.mxu3  ;;  %v916_v30 = vld [vmem:[%s2308_s8 + $0x18] sm:$0xff] }
 0x122   : > { %v744_v34 = vadd.f32 %v743_v32, %v1953_v29  ;;  %936 = vmatpush.msrb.mxu0 %v916_v30  ;;  %v914_v32 = vld [vmem:[%s2308_s8 + $0x8] sm:$0xff]  ;;  %v1657_v30 = vld [vmem:[%s2302_s2 + $0x160] sm:$0xff] }
 0x123   : > { %v747_v33 = vsel %vm746_vm2, %v718_v31, -inf }
 0x124   : > { %748 = vmax.xlane.f32.xlu0 %v747_v33  ;;  %v750_v35 = vsel %vm746_vm2, %v744_v34, -inf  ;;  %v913_v33 = vld [vmem:[%s2308_s8] sm:$0xff] }
 0x12c   : > { %751 = vmax.xlane.f32.xlu0 %v750_v35 }
 0x197   : > { %v749_v44 = vpop.xlane.xlu0 %748 }
 0x198   : > { %v753_v45 = vsub.f32 %v718_v31, %v749_v44  ;;  %v915_v31 = vld [vmem:[%s2308_s8 + $0x10] sm:$0xff]  ;;  %v1723_v44 = vld [vmem:[%s2306_s6] ss:$0 sm:$0xff] }
 0x199   : > { %937 = vmatpush.msrb.mxu0 %v915_v31 }
 0x19a   : > { %v755_v46 = vmul.f32 1.442695, %v753_v45 }
 0x19b   : > { %938 = vmatpush.msrb.mxu0 %v914_v32 }
 0x19c   : > { %1742 = vpow2.f32 %v755_v46 }
 0x19d   : > { %939 = vmatpush.msrb.mxu0 %v913_v33 }
 0x19f   : > { %v752_v47 = vpop.xlane.xlu0 %751 }
 0x1a0   : > { %v754_v48 = vsub.f32 %v744_v34, %v752_v47  ;;  %v948_v34 = vld [vmem:[%s2310_s10 + $0x18] sm:$0xff]  ;;  %v1724_v47 = vld [vmem:[%s2307_s7] ss:$0 sm:$0xff] }
 0x1a1   : > { %968 = vmatpush.msrb.mxu1 %v948_v34 }
 0x1a2   : > { %v1743_v49 = vpop.eup %1742  ;;  %v757_v50 = vmul.f32 1.442695, %v754_v48 }
 0x1a3   : > { %v759_v51 = vsel %vm746_vm2, %v1743_v49, 0.0 }
 0x1a4   : > { %1744 = vpow2.f32 %v757_v50  ;;  %760 = vadd.xlane.f32.xlu1 %v759_v51  ;;  %v947_v50 = vld [vmem:[%s2310_s10 + $0x10] sm:$0xff]  ;;  %v946_v51 = vld [vmem:[%s2310_s10 + $0x8] sm:$0xff] }
 0x1a5   : > { %969 = vmatpush.msrb.mxu1 %v947_v50  ;;  %v1731_v50 = vld [vmem:[%s2303_s3 + $0x6] ss:$0 sm:$0xff] }
 0x1a7   : > { %970 = vmatpush.msrb.mxu1 %v946_v51  ;;  %v1732_v51 = vld [vmem:[%s2303_s3 + $0x7] ss:$0 sm:$0xff] }
 0x1aa   : > { %v1745_v52 = vpop.eup %1744 }
 0x1ab   : > { %v762_v53 = vsel %vm746_vm2, %v1745_v52, 0.0 }
 0x1ac   : > { %763 = vadd.xlane.f32.xlu1 %v762_v53  ;;  %v1725_v53 = vld [vmem:[%s2309_s9] ss:$0 sm:$0xff] }
 0x217   : > { %v761_v61 = vpop.xlane.xlu1 %760 }
 0x218   : > { %1746 = vrcp.f32 %v761_v61 }
 0x21e   : > { %v1747_v62 = vpop.eup %1746 }
 0x21f   : > { %v767_v63 = vmul.f32 %v1747_v62, %v1743_v49  ;;  %v764_v0 = vpop.xlane.xlu1 %763 }
 0x220   : > { %1748 = vrcp.f32 %v764_v0 }
 0x221   : > { %1631 = vmatmul.msk.f32.vlgmr.msra.gmra.mxu0 %vm746_vm2, %v767_v63  ;;  %1750 = vrcp.f32 %v1776_v18  ;;  %v1645_v18 = vld [vmem:[%s2302_s2 + $0x100] sm:$0xff] }
 0x222   : > { %1114 = vmatpush.msra.mxu0 %v1648_v5 }
 0x226   : > { %v1749_v1 = vpop.eup %1748 }
 0x227   : > { %v768_v2 = vmul.f32 %v1749_v1, %v1745_v52  ;;  %v1751_v19 = vpop.eup %1750  ;;  %v945_v52 = vld [vmem:[%s2310_s10] sm:$0xff] }
 0x228   : > { %v880_v20 = vmul.f32 32.0, %v1751_v19  ;;  %vm884_vm3 = vweird.f32 %v1751_v19  ;;  %971 = vmatpush.msrb.mxu1 %v945_v52 }
 0x229   : > { %1632 = vmatmul.msk.f32.vlgmr.msra.gmra.mxu1 %vm746_vm2, %v768_v2 }
 0x22a   : > { %v881_v21 = vsub.f32 1.0, %v880_v20  ;;  %v1656_v20 = vld [vmem:[%s2302_s2 + $0x158] sm:$0xff] }
 0x22c   : > { %v882_v22 = vmul.f32 %v1751_v19, %v881_v21  ;;  %v1660_v21 = vld [vmem:[%s2302_s2 + $0x178] sm:$0xff] }
 0x22e   : > { %v883_v23 = vadd.f32 %v1751_v19, %v882_v22  ;;  %v1655_v22 = vld [vmem:[%s2302_s2 + $0x150] sm:$0xff] }
 0x230   : > { %v2018_v24 = vsel %vm884_vm3, %v1751_v19, %v883_v23  ;;  %v1649_v19 = vld [vmem:[%s2302_s2 + $0x120] sm:$0xff]  ;;  %v1659_v23 = vld [vmem:[%s2302_s2 + $0x170] sm:$0xff] }
 0x29e   : > { %v789_v6 = vpop.f32.mrf.mxu0 }
 0x29f   : > { %1633 = vmatmul.msk.f32.vlgmr.msra.gmra.mxu2 %vm693_vm1, %v789_v6  ;;  %v1652_v6 = vld [vmem:[%s2302_s2 + $0x138] sm:$0xff] }
 0x2a0   : > { %1134 = vmatpush.msra.mxu1 %v1652_v6 }
 0x2a6   : > { %v812_v7 = vpop.f32.mrf.mxu1 }
 0x2a7   : > { %1634 = vmatmul.msk.f32.vlgmr.msra.gmra.mxu3 %vm693_vm1, %v812_v7  ;;  %v1639_v7 = vld [vmem:[%s2302_s2 + $0xd0] sm:$0xff] }
 0x2a8   : > { %1075 = vmatpush.msrb.mxu2 %v1639_v7 }
 0x322   : > { %v839_v8 = vpop.f32.mrf.mxu2 }
 0x323   : > { %v865_v11 = vsel %vm569_vm0, %v839_v8, 0.0  ;;  %v1643_v8 = vld [vmem:[%s2302_s2 + $0xf0] sm:$0xff] }
 0x324   : > { %1095 = vmatpush.msrb.mxu3 %v1643_v8 }
 0x32a   : > { %v862_v9 = vpop.f32.mrf.mxu3 }
 0x32b   : > { %v866_v12 = vsel %vm569_vm0, %v862_v9, 0.0  ;;  %v1647_v9 = vld [vmem:[%s2302_s2 + $0x110] sm:$0xff] }
 0x32c   : > { %v867_v13 = vadd.f32 %v866_v12, %v865_v11  ;;  %1115 = vmatpush.msra.mxu0 %v1647_v9  ;;  %v1638_v11 = vld [vmem:[%s2302_s2 + $0xc8] sm:$0xff] }
 0x32d   : > { %v1642_v12 = vld [vmem:[%s2302_s2 + $0xe8] sm:$0xff]  ;;  %1076 = vmatpush.msrb.mxu2 %v1638_v11 }
 0x32e   : > { %v872_v14 = vadd.f32 %v1722_v10, %v867_v13  ;;  %v1651_v10 = vld [vmem:[%s2302_s2 + $0x130] sm:$0xff]  ;;  %v1646_v13 = vld [vmem:[%s2302_s2 + $0x108] sm:$0xff]  ;;  %1096 = vmatpush.msrb.mxu3 %v1642_v12 }
 0x32f   : > { %1135 = vmatpush.msra.mxu1 %v1651_v10  ;;  %1116 = vmatpush.msra.mxu0 %v1646_v13  ;;  %v1680_v13 = vld [vmem:[%s2304_s4 + $0x28] sm:$0xff] }
 0x330   : > { %v873_v16 = vadd.f32 %v872_v14, %v1921_v15  ;;  %v1650_v14 = vld [vmem:[%s2302_s2 + $0x128] sm:$0xff] }
 0x331   : > { %1136 = vmatpush.msra.mxu1 %v1650_v14  ;;  %1117 = vmatpush.msra.mxu0 %v1645_v18  ;;  %v1682_v14 = vld [vmem:[%s2304_s4 + $0x38] sm:$0xff] }
 0x332   : > { %v876_v17 = vsel %vm569_vm0, %v873_v16, 0.0 }
 0x333   : > { %877 = vadd.xlane.f32.xlu2 %v876_v17  ;;  %v1641_v17 = vld [vmem:[%s2302_s2 + $0xe0] sm:$0xff]  ;;  %1137 = vmatpush.msra.mxu1 %v1649_v19 }
 0x334   : > { %1097 = vmatpush.msrb.mxu3 %v1641_v17 }
 0x336   : > { %1174 = vmatpush.msra.mxu3 %v1660_v21 }
 0x338   : > { %1175 = vmatpush.msra.mxu3 %v1659_v23  ;;  %v1681_v23 = vld [vmem:[%s2304_s4 + $0x30] sm:$0xff] }
 0x3a6   : > { %v878_v25 = vpop.xlane.xlu2 %877 }
 0x3a7   : > { %v886_v26 = vmul.f32 %v2018_v24, %v878_v25 }
 0x3a9   : > { %v887_v27 = vsub.f32 %v873_v16, %v886_v26  ;;  %v1637_v16 = vld [vmem:[%s2302_s2 + $0xc0] sm:$0xff]  ;;  %v1654_v26 = vld [vmem:[%s2302_s2 + $0x148] sm:$0xff] }
 0x3aa   : > { %1077 = vmatpush.msrb.mxu2 %v1637_v16 }
 0x3ab   : > { %v888_v28 = vmul.f32 %v887_v27, %v887_v27 }
 0x3ac   : > { %1154 = vmatpush.msra.mxu2 %v1656_v20 }
 0x3ad   : > { %v889_v15 = vsel %vm569_vm0, %v888_v28, 0.0 }
 0x3ae   : > { %890 = vadd.xlane.f32.xlu2 %v889_v15  ;;  %1155 = vmatpush.msra.mxu2 %v1655_v22  ;;  %v1653_v15 = vld [vmem:[%s2302_s2 + $0x140] sm:$0xff] }
 0x3af   : > { %v1679_v22 = vld [vmem:[%s2304_s4 + $0x20] sm:$0xff] }
 0x3b0   : > { %1156 = vmatpush.msra.mxu2 %v1654_v26 }
 0x3b2   : > { %1157 = vmatpush.msra.mxu2 %v1653_v15 }
 0x421   : > { %v891_v35 = vpop.xlane.xlu2 %890 }
 0x422   : > { %v892_v36 = vmul.f32 %v891_v35, %v2018_v24 }
 0x424   : > { %v893_v37 = vadd.f32 1e-05, %v892_v36 }
 0x426   : > { %1752 = vrsqrt.f32 %v893_v37  ;;  %vm900_vm5 = vweird.f32 %v893_v37 }
 0x42c   : > { %v1753_v38 = vpop.eup %1752 }
 0x42d   : > { %v895_v39 = vmul.f32 %v1753_v38, %v893_v37  ;;  %vm901_vm4 = vweird.f32 %v1753_v38 }
 0x42e   : > { %vm902_vm6 = vmor %vm900_vm5, %vm901_vm4 }
 0x42f   : > { %v896_v40 = vmul.f32 %v1753_v38, %v895_v39 }
 0x431   : > { %v897_v41 = vmul.f32 0.5, %v896_v40  ;;  %v1728_v40 = vld [vmem:[%s2313_s13] ss:$0 sm:$0xff] }
 0x433   : > { %v898_v42 = vsub.f32 1.5, %v897_v41 }
 0x435   : > { %v899_v43 = vmul.f32 %v1753_v38, %v898_v42 }
 0x437   : > { %v903_v45 = vsel %vm902_vm6, %v1753_v38, %v899_v43  ;;  %v1727_v38 = vld [vmem:[%s2312_s12] ss:$0 sm:$0xff] }
 0x438   : > { %v904_v46 = vmul.f32 %v903_v45, %v887_v27  ;;  %v1658_v27 = vld [vmem:[%s2302_s2 + $0x168] sm:$0xff] }
 0x439   : > { %1176 = vmatpush.msra.mxu3 %v1658_v27  ;;  %v1730_v45 = vld [vmem:[%s2303_s3 + $0x9] ss:$0 sm:$0xff] }
 0x43a   : > { %v908_v48 = vmul.f32 %v1723_v44, %v904_v46  ;;  %v1729_v44 = vld [vmem:[%s2303_s3 + $0x8] ss:$0 sm:$0xff] }
 0x43b   : > { %1177 = vmatpush.msra.mxu3 %v1657_v30  ;;  %v1735_v30 = vld [vmem:[%s2305_s5 + $0x1] ss:$0 sm:$0xff] }
 0x43c   : > { %v912_v49 = vadd.f32 %v1724_v47, %v908_v48 }
 0x43e   : > { %1635 = vmatmul.msk.f32.vlgmr.msrb.gmra.mxu0 %vm569_vm0, %v912_v49 }
 0x4bb   : > { %v941_v54 = vpop.f32.mrf.mxu0 }
 0x4bc   : > { %v942_v55 = vadd.f32 %v1725_v53, %v941_v54 }
 0x4be   : > { %v944_v56 = vmax.f32 %v942_v55, 0.0 }
 0x4c0   : > { %1636 = vmatmul.msk.f32.vlgmr.msrb.gmra.mxu1 %vm569_vm0, %v944_v56  ;;  %v1733_v56 = vld [vmem:[%s2303_s3 + $0xa] ss:$0 sm:$0xff] }
 0x53d   : > { %v973_v58 = vpop.f32.mrf.mxu1 }
 0x53e   : > { %v974_v59 = vadd.f32 %v1726_v57, %v973_v58  ;;  %v1734_v57 = vld [vmem:[%s2303_s3 + $0xb] ss:$0 sm:$0xff] }
 0x540   : > { %v976_v60 = vadd.f32 %v974_v59, %v912_v49 }
 0x542   : > { %v979_v61 = vsel %vm569_vm0, %v976_v60, 0.0 }
 0x543   : > { %980 = vadd.xlane.f32.xlu0 %v979_v61 }
 0x5b6   : > { %v981_v62 = vpop.xlane.xlu0 %980 }
 0x5b7   : > { %v982_v63 = vmul.f32 %v981_v62, %v2018_v24 }
 0x5b9   : > { %v2063_v0 = vsub.f32 %v976_v60, %v982_v63 }
 0x5bb   : > { %v984_v1 = vmul.f32 %v2063_v0, %v2063_v0 }
 0x5bd   : > { %v985_v2 = vsel %vm569_vm0, %v984_v1, 0.0 }
 0x5be   : > { %986 = vadd.xlane.f32.xlu1 %v985_v2 }
 0x631   : > { %v987_v25 = vpop.xlane.xlu1 %986 }
 0x632   : > { %v988_v28 = vmul.f32 %v987_v25, %v2018_v24 }
 0x634   : > { %v989_v31 = vadd.f32 1e-05, %v988_v28 }
 0x636   : > { %1754 = vrsqrt.f32 %v989_v31  ;;  %vm996_vm8 = vweird.f32 %v989_v31 }
 0x63c   : > { %v1755_v32 = vpop.eup %1754 }
 0x63d   : > { %v991_v33 = vmul.f32 %v1755_v32, %v989_v31  ;;  %vm997_vm7 = vweird.f32 %v1755_v32 }
 0x63e   : > { %vm998_vm9 = vmor %vm996_vm8, %vm997_vm7 }
 0x63f   : > { %v992_v34 = vmul.f32 %v1755_v32, %v991_v33 }
 0x641   : > { %v993_v35 = vmul.f32 0.5, %v992_v34 }
 0x643   : > { %v994_v36 = vsub.f32 1.5, %v993_v35 }
 0x645   : > { %v995_v37 = vmul.f32 %v1755_v32, %v994_v36 }
 0x647   : > { %v999_v39 = vsel %vm998_vm9, %v1755_v32, %v995_v37 }
 0x648   : > { %v1000_v41 = vmul.f32 %v999_v39, %v2063_v0 }
 0x64a   : > { %v1004_v42 = vmul.f32 %v1727_v38, %v1000_v41  ;;  %v1691_v41 = vld [vmem:[%s2308_s8 + $0x38] sm:$0xff] }
 0x64c   : > { %v2148_v43 = vadd.f32 %v1728_v40, %v1004_v42  ;;  %v1690_v42 = vld [vmem:[%s2308_s8 + $0x30] sm:$0xff] }
 0x64e   : > { %1667 = vmatmul.msk.f32.vlgmr.msrb.gmra.mxu2 %vm569_vm0, %v2148_v43  ;;  %1668 = vmatmul.msk.f32.vlgmr.msrb.gmra.mxu3 %vm569_vm0, %v2148_v43 }
 0x64f   : > { %1669 = vmatmul.msk.f32.vlgmr.msra.gmra.mxu0 %vm569_vm0, %v2148_v43  ;;  %1670 = vmatmul.msk.f32.vlgmr.msra.gmra.mxu1 %vm569_vm0, %v2148_v43 }
 0x656   : > { %1671 = vmatmul.msk.f32.vlgmr.msra.gmra.mxu2 %vm569_vm0, %v2148_v43  ;;  %1672 = vmatmul.msk.f32.vlgmr.msra.gmra.mxu3 %vm569_vm0, %v2148_v43 }
 0x6cc   : > { %v1119_v46 = vpop.f32.mrf.mxu0  ;;  %v1139_v47 = vpop.f32.mrf.mxu1 }
 0x6cd   : > { %v1120_v48 = vadd.f32 %v1729_v44, %v1119_v46  ;;  %v1140_v49 = vadd.f32 %v1730_v45, %v1139_v47  ;;  %v1688_v44 = vld [vmem:[%s2308_s8 + $0x20] sm:$0xff]  ;;  %v1697_v45 = vld [vmem:[%s2310_s10 + $0x38] sm:$0xff] }
 0x6cf   : > { %1673 = vmatpush.xpose.msk.msrb.mxu0 %vm693_vm1, %v1120_v48  ;;  %1675 = vmatpush.xpose.msk.msrb.mxu1 %vm693_vm1, %v1140_v49 }
 0x6d1   : > { %v1079_v52 = vpop.f32.mrf.mxu2  ;;  %v1099_v53 = vpop.f32.mrf.mxu3 }
 0x6d2   : > { %v1080_v54 = vadd.f32 %v1731_v50, %v1079_v52  ;;  %v1100_v55 = vadd.f32 %v1732_v51, %v1099_v53 }
 0x6d3   : > { %1324 = vmatpush.msra.mxu0 %v1680_v13  ;;  %1347 = vmatpush.msra.mxu1 %v1682_v14  ;;  %v1505_v13 = vld [vmem:[%s2314_s14 + $0x30] sm:$0xff]  ;;  %v1506_v14 = vld [vmem:[%s2314_s14 + $0x38] sm:$0xff] }
 0x6d4   : > { %1674 = vmatmul.msk.f32.vlgmr.msrb.gmra.mxu0 %vm693_vm1, %v1080_v54  ;;  %1676 = vmatmul.msk.f32.vlgmr.msrb.gmra.mxu1 %vm693_vm1, %v1100_v55  ;;  %v1736_v55 = vld [vmem:[%s2306_s6 + $0x1] ss:$0 sm:$0xff] }
 0x6d5   : > { %1325 = vmatpush.msra.mxu0 %v1679_v22  ;;  %1348 = vmatpush.msra.mxu1 %v1681_v23 }
 0x6d7   : > { %1528 = vmatpush.msrb.mxu0 %v1505_v13  ;;  %1548 = vmatpush.msrb.mxu1 %v1506_v14 }
 0x6d9   : > { %v1159_v58 = vpop.f32.mrf.mxu2  ;;  %v1179_v59 = vpop.f32.mrf.mxu3 }
 0x6da   : > { %v1160_v60 = vadd.f32 %v1733_v56, %v1159_v58  ;;  %v1180_v61 = vadd.f32 %v1734_v57, %v1179_v59  ;;  %v1737_v58 = vld [vmem:[%s2307_s7 + $0x1] ss:$0 sm:$0xff] }
 0x6dc   : > { %1274 = vmatpush.msrb.mxu2 %v1160_v60  ;;  %1297 = vmatpush.msrb.mxu3 %v1180_v61  ;;  %v1696_v61 = vld [vmem:[%s2310_s10 + $0x30] sm:$0xff] }
 0x6de   : > { %1422 = vmatpush.msra.mxu2 %v1691_v41  ;;  %1456 = vmatpush.msra.mxu3 %v1697_v45 }
 0x6e0   : > { %1423 = vmatpush.msra.mxu2 %v1690_v42  ;;  %1457 = vmatpush.msra.mxu3 %v1696_v61 }
 0x751   : > { %v1205_v62 = vpop.f32.mrf.mxu0  ;;  %v1231_v63 = vpop.f32.mrf.mxu1 }
 0x752   : > { %v1206_v0 = vadd.f32 %v1205_v62, %v1953_v29  ;;  %v1232_v1 = vadd.f32 %v1231_v63, %v1953_v29  ;;  %v1695_v62 = vld [vmem:[%s2310_s10 + $0x28] sm:$0xff]  ;;  %v1694_v63 = vld [vmem:[%s2310_s10 + $0x20] sm:$0xff] }
 0x753   : > { %1458 = vmatpush.msra.mxu3 %v1695_v62 }
 0x754   : > { %v1237_v2 = vsel %vm746_vm2, %v1232_v1, -inf  ;;  %v1234_v3 = vsel %vm746_vm2, %v1206_v0, -inf }
 0x755   : > { %1238 = vmax.xlane.f32.xlu0 %v1237_v2  ;;  %1235 = vmax.xlane.f32.xlu2 %v1234_v3 }
 0x756   : > { %1459 = vmatpush.msra.mxu3 %v1694_v63 }
 0x7c8   : > { %v1239_v4 = vpop.xlane.xlu0 %1238  ;;  %v1236_v5 = vpop.xlane.xlu2 %1235 }
 0x7c9   : > { %v1241_v6 = vsub.f32 %v1232_v1, %v1239_v4  ;;  %v1240_v7 = vsub.f32 %v1206_v0, %v1236_v5  ;;  %v1738_v0 = vld [vmem:[%s2309_s9 + $0x1] ss:$0 sm:$0xff] }
 0x7ca   : > { %v1739_v4 = vld [vmem:[%s2311_s11 + $0x1] ss:$0 sm:$0xff] }
 0x7cb   : > { %v1244_v8 = vmul.f32 1.442695, %v1241_v6  ;;  %v1242_v9 = vmul.f32 1.442695, %v1240_v7 }
 0x7cd   : > { %1756 = vpow2.f32 %v1244_v8 }
 0x7ce   : > { %1758 = vpow2.f32 %v1242_v9 }
 0x7d3   : > { %v1757_v10 = vpop.eup %1756 }
 0x7d4   : > { %v1759_v11 = vpop.eup %1758  ;;  %v1249_v12 = vsel %vm746_vm2, %v1757_v10, 0.0 }
 0x7d5   : > { %1250 = vadd.xlane.f32.xlu2 %v1249_v12  ;;  %v1246_v29 = vsel %vm746_vm2, %v1759_v11, 0.0 }
 0x7d6   : > { %1247 = vadd.xlane.f32.xlu1 %v1246_v29 }
 0x848   : > { %v1251_v16 = vpop.xlane.xlu2 %1250 }
 0x849   : > { %v1248_v17 = vpop.xlane.xlu1 %1247  ;;  %1760 = vrcp.f32 %v1251_v16  ;;  %v1503_v16 = vld [vmem:[%s2314_s14 + $0x20] sm:$0xff] }
 0x84a   : > { %1762 = vrcp.f32 %v1248_v17  ;;  %v1504_v17 = vld [vmem:[%s2314_s14 + $0x28] sm:$0xff]  ;;  %1529 = vmatpush.msrb.mxu0 %v1503_v16 }
 0x84b   : > { %1549 = vmatpush.msrb.mxu1 %v1504_v17 }
 0x84f   : > { %v1761_v18 = vpop.eup %1760 }
 0x850   : > { %v1763_v19 = vpop.eup %1762  ;;  %v1255_v20 = vmul.f32 %v1761_v18, %v1757_v10  ;;  %v1501_v18 = vld [vmem:[%s2314_s14 + $0x10] sm:$0xff] }
 0x851   : > { %v1254_v21 = vmul.f32 %v1763_v19, %v1759_v11  ;;  %v1502_v19 = vld [vmem:[%s2314_s14 + $0x18] sm:$0xff]  ;;  %1530 = vmatpush.msrb.mxu0 %v1501_v18 }
 0x852   : > { %1678 = vmatmul.msk.f32.vlgmr.msrb.gmra.mxu3 %vm746_vm2, %v1255_v20  ;;  %v1499_v20 = vld [vmem:[%s2314_s14] sm:$0xff]  ;;  %1550 = vmatpush.msrb.mxu1 %v1502_v19 }
 0x853   : > { %1677 = vmatmul.msk.f32.vlgmr.msrb.gmra.mxu2 %vm746_vm2, %v1254_v21  ;;  %v1500_v21 = vld [vmem:[%s2314_s14 + $0x8] sm:$0xff]  ;;  %1531 = vmatpush.msrb.mxu0 %v1499_v20 }
 0x854   : > { %1551 = vmatpush.msrb.mxu1 %v1500_v21 }
 0x8d5   : > { %v1299_v25 = vpop.f32.mrf.mxu3 }
 0x8d6   : > { %v1276_v26 = vpop.f32.mrf.mxu2  ;;  %1684 = vmatmul.msk.f32.vlgmr.msra.gmra.mxu1 %vm693_vm1, %v1299_v25 }
 0x8d7   : > { %1683 = vmatmul.msk.f32.vlgmr.msra.gmra.mxu0 %vm693_vm1, %v1276_v26 }
 0x953   : > { %v1350_v27 = vpop.f32.mrf.mxu1 }
 0x954   : > { %v1327_v28 = vpop.f32.mrf.mxu0  ;;  %v1354_v15 = vsel %vm569_vm0, %v1350_v27, 0.0 }
 0x955   : > { %v1353_v31 = vsel %vm569_vm0, %v1327_v28, 0.0 }
 0x956   : > { %v1355_v32 = vadd.f32 %v1354_v15, %v1353_v31 }
 0x958   : > { %v1361_v33 = vadd.f32 %v1735_v30, %v1355_v32  ;;  %v1740_v32 = vld [vmem:[%s2312_s12 + $0x1] ss:$0 sm:$0xff] }
 0x95a   : > { %v1362_v34 = vadd.f32 %v1361_v33, %v2148_v43  ;;  %v1689_v43 = vld [vmem:[%s2308_s8 + $0x28] sm:$0xff] }
 0x95b   : > { %1424 = vmatpush.msra.mxu2 %v1689_v43 }
 0x95c   : > { %v1367_v35 = vsel %vm569_vm0, %v1362_v34, 0.0 }
 0x95d   : > { %1368 = vadd.xlane.f32.xlu0 %v1367_v35  ;;  %1425 = vmatpush.msra.mxu2 %v1688_v44 }
 0x9d0   : > { %v1369_v36 = vpop.xlane.xlu0 %1368 }
 0x9d1   : > { %v1370_v37 = vmul.f32 %v1369_v36, %v2018_v24 }
 0x9d3   : > { %v1371_v38 = vsub.f32 %v1362_v34, %v1370_v37  ;;  %v1507_v37 = vld [vmem:[%s2315_s15] sm:$0x3] }
 0x9d5   : > { %v1372_v39 = vmul.f32 %v1371_v38, %v1371_v38 }
 0x9d7   : > { %v1373_v40 = vsel %vm569_vm0, %v1372_v39, 0.0  ;;  %v1510_v39 = vperm.slane %v1507_v37, 1 }
 0x9d8   : > { %1374 = vadd.xlane.f32.xlu1 %v1373_v40 }
 0xa4b   : > { %v1375_v46 = vpop.xlane.xlu1 %1374 }
 0xa4c   : > { %v1376_v47 = vmul.f32 %v1375_v46, %v2018_v24 }
 0xa4e   : > { %v1377_v48 = vadd.f32 1e-05, %v1376_v47 }
 0xa50   : > { %1764 = vrsqrt.f32 %v1377_v48  ;;  %vm1384_vm11 = vweird.f32 %v1377_v48 }
 0xa56   : > { %v1765_v49 = vpop.eup %1764 }
 0xa57   : > { %v1379_v50 = vmul.f32 %v1765_v49, %v1377_v48  ;;  %vm1385_vm10 = vweird.f32 %v1765_v49 }
 0xa58   : > { %vm1386_vm12 = vmor %vm1384_vm11, %vm1385_vm10 }
 0xa59   : > { %v1380_v51 = vmul.f32 %v1765_v49, %v1379_v50 }
 0xa5b   : > { %v1381_v52 = vmul.f32 0.5, %v1380_v51 }
 0xa5d   : > { %v1382_v53 = vsub.f32 1.5, %v1381_v52 }
 0xa5f   : > { %v1383_v54 = vmul.f32 %v1765_v49, %v1382_v53 }
 0xa61   : > { %v1387_v56 = vsel %vm1386_vm12, %v1765_v49, %v1383_v54 }
 0xa62   : > { %v1388_v57 = vmul.f32 %v1387_v56, %v1371_v38  ;;  %v1509_v38 = vperm.slane %v1507_v37, 0 }
 0xa64   : > { %v1392_v59 = vmul.f32 %v1736_v55, %v1388_v57 }
 0xa66   : > { %v1396_v60 = vadd.f32 %v1737_v58, %v1392_v59 }
 0xa68   : > { %1693 = vmatmul.msk.f32.vlgmr.msra.gmra.mxu2 %vm569_vm0, %v1396_v60 }
 0xaeb   : > { %v1427_v1 = vpop.f32.mrf.mxu2 }
 0xaec   : > { %v1428_v2 = vadd.f32 %v1738_v0, %v1427_v1 }
 0xaee   : > { %v1430_v3 = vmax.f32 %v1428_v2, 0.0 }
 0xaf0   : > { %1699 = vmatmul.msk.f32.vlgmr.msra.gmra.mxu3 %vm569_vm0, %v1430_v3 }
 0xb73   : > { %v1461_v5 = vpop.f32.mrf.mxu3 }
 0xb74   : > { %v1462_v6 = vadd.f32 %v1739_v4, %v1461_v5 }
 0xb76   : > { %v1464_v7 = vadd.f32 %v1462_v6, %v1396_v60 }
 0xb78   : > { %v1469_v8 = vsel %vm569_vm0, %v1464_v7, 0.0 }
 0xb79   : > { %1470 = vadd.xlane.f32.xlu2 %v1469_v8 }
 0xbec   : > { %v1471_v9 = vpop.xlane.xlu2 %1470 }
 0xbed   : > { %v1472_v10 = vmul.f32 %v1471_v9, %v2018_v24 }
 0xbef   : > { %v1473_v11 = vsub.f32 %v1464_v7, %v1472_v10 }
 0xbf1   : > { %v1474_v12 = vmul.f32 %v1473_v11, %v1473_v11 }
 0xbf3   : > { %v1475_v29 = vsel %vm569_vm0, %v1474_v12, 0.0 }
 0xbf4   : > { %1476 = vadd.xlane.f32.xlu0 %v1475_v29 }
 0xc67   : > { %v1477_v22 = vpop.xlane.xlu0 %1476 }
 0xc68   : > { %v1478_v23 = vmul.f32 %v1477_v22, %v2018_v24  ;;  %v1741_v24 = vld [vmem:[%s2313_s13 + $0x1] ss:$0 sm:$0xff] }
 0xc6a   : > { %v1479_v25 = vadd.f32 1e-05, %v1478_v23 }
 0xc6c   : > { %1766 = vrsqrt.f32 %v1479_v25  ;;  %vm1486_vm14 = vweird.f32 %v1479_v25 }
 0xc72   : > { %v1767_v26 = vpop.eup %1766 }
 0xc73   : > { %v1481_v27 = vmul.f32 %v1767_v26, %v1479_v25  ;;  %vm1487_vm13 = vweird.f32 %v1767_v26 }
 0xc74   : > { %vm1488_vm15 = vmor %vm1486_vm14, %vm1487_vm13 }
 0xc75   : > { %v1482_v28 = vmul.f32 %v1767_v26, %v1481_v27 }
 0xc77   : > { %v1483_v15 = vmul.f32 0.5, %v1482_v28 }
 0xc79   : > { %v1484_v30 = vsub.f32 1.5, %v1483_v15 }
 0xc7b   : > { %v1485_v31 = vmul.f32 %v1767_v26, %v1484_v30 }
 0xc7d   : > { %v1489_v33 = vsel %vm1488_vm15, %v1767_v26, %v1485_v31 }
 0xc7e   : > { %v1490_v34 = vmul.f32 %v1489_v33, %v1473_v11 }
 0xc80   : > { %v1494_v35 = vmul.f32 %v1740_v32, %v1490_v34 }
 0xc82   : > { %v1498_v36 = vadd.f32 %v1741_v24, %v1494_v35 }
 0xc84   : > { %1702 = vmatmul.msk.f32.vlgmr.msrb.gmra.mxu0 %vm569_vm0, %v1498_v36  ;;  %1703 = vmatmul.msk.f32.vlgmr.msrb.gmra.mxu1 %vm569_vm0, %v1498_v36 }
 0xd01   : > { %v1533_v40 = vpop.f32.mrf.mxu0  ;;  %v1553_v41 = vpop.f32.mrf.mxu1 }
 0xd02   : > { %v1534_v42 = vadd.f32 %v1533_v40, %v1509_v38  ;;  %v1554_v43 = vadd.f32 %v1553_v41, %v1510_v39 }
 0xd04   : > { %1556 = vst [vmem:[%s518_s26] sm:$0xff] %v1534_v42 }
 0xd05   : > { %1557 = vst [vmem:[%s518_s26 + $0x8] sm:$0xff] %v1554_v43 }
 0xd06 PF: > { %s26_s21 = sadd.s32 1, %s1774_s21  }
 0xd07   : > { %p23_p4 = scmp.ge.s32.totalorder %s26_s21, 4  }
 0xd09   :  { %25 = sbr.rel (!%p23_p4) target bundleno = 2 (0x2), region = 126 }

</bundles_post_ra>
